<compile_context>
chip_gen: v7x
topology: tpu7x:2x2x1
jax: 0.10.0
libtpu: 0.0.40
codegen_flags: <defaults>
</compile_context>

<pallas_src>
import functools

import jax
import jax.numpy as jnp
import numpy as np
from jax.experimental import pallas as pl
from jax.experimental.pallas import tpu as pltpu

BN_EPS = 1e-5


def _round_up(x, m):
    return (x + m - 1) // m * m


@functools.lru_cache(maxsize=1)
def _vmem_limit_bytes():
    # ~3/4 of physical VMEM with headroom; clamp so we never request the full
    # 64 MiB of a v7x TensorCore.  48-56 MiB is plenty for these tile sizes.
    try:
        cap = int(pltpu.get_tpu_info().vmem_capacity_bytes)
    except Exception:
        cap = 64 * 1024 * 1024
    return int(max(32 * 1024 * 1024, min(cap * 3 // 4, 56 * 1024 * 1024)))


def _pick_tile_n(cp, target=512):
    """Largest multiple of 128 that divides cp and is <= target."""
    if cp <= target:
        return cp
    for cand in range(target, 127, -128):
        if cp % cand == 0:
            return cand
    return cp


# --------------------- Pass 1: conv matmul + partial BN stats --------------- #
def _conv_stats_kernel(a_ref, w_ref, y_ref, stats_ref):
    # bf16 x bf16 -> f32 accumulation on the MXU.
    conv = jnp.dot(a_ref[...], w_ref[...], preferred_element_type=jnp.float32)
    y_ref[...] = conv.astype(y_ref.dtype)
    # Per-tile partial statistics (disjoint per grid point -> "parallel" axes,
    # no resident accumulator, no pl.when init, no concatenate relayout).
    stats_ref[0:1, :] = jnp.sum(conv, axis=0, keepdims=True)
    stats_ref[1:2, :] = jnp.sum(conv * conv, axis=0, keepdims=True)


def _conv_stats(a, w, tile_m, tile_n):
    m_pad, k = a.shape
    cp = w.shape[1]
    mt, nt = m_pad // tile_m, cp // tile_n
    return pl.pallas_call(
        _conv_stats_kernel,
        out_shape=(jax.ShapeDtypeStruct((m_pad, cp), jnp.bfloat16),
                   jax.ShapeDtypeStruct((mt, 2, cp), jnp.float32)),
        grid=(mt, nt),
        in_specs=[pl.BlockSpec((tile_m, k), lambda i, j: (i, 0)),
                  pl.BlockSpec((k, tile_n), lambda i, j: (0, j))],
        out_specs=(pl.BlockSpec((tile_m, tile_n), lambda i, j: (i, j)),
                   pl.BlockSpec((None, 2, tile_n), lambda i, j: (i, 0, j))),
        compiler_params=pltpu.CompilerParams(
            dimension_semantics=("parallel", "parallel"),   # megacore on v7x
            vmem_limit_bytes=_vmem_limit_bytes()),
    )(a, w)


# ---------- Pass 2: pre-folded BN scale/shift (+residual) (+ReLU) ----------- #
def _bn_apply_kernel(y_ref, ss_ref, *rest, add_residual, apply_relu):
    if add_residual:
        res_ref, o_ref = rest
    else:
        (o_ref,) = rest
    ss = ss_ref[...]                                  # (2, Cp): [scale; shift]
    # bf16 loads, f32 math (v5e guard rail), single FMA per element.
    out = y_ref[...].astype(jnp.float32) * ss[0:1, :] + ss[1:2, :]
    if add_residual:
        out = out + res_ref[...].astype(jnp.float32)
    if apply_relu:
        out = jnp.maximum(out, 0.0)
    o_ref[...] = out.astype(o_ref.dtype)


def _bn_apply(y, scale_shift, residual, apply_relu, tile_m, out_dtype):
    m_pad, cp = y.shape
    add_residual = residual is not None

    in_specs = [pl.BlockSpec((tile_m, cp), lambda i: (i, 0)),
                pl.BlockSpec((2, cp), lambda i: (0, 0))]
    args = [y, scale_shift]
    if add_residual:
        in_specs.append(pl.BlockSpec((tile_m, cp), lambda i: (i, 0)))
        args.append(residual)

    kern = functools.partial(_bn_apply_kernel, add_residual=add_residual,
                             apply_relu=apply_relu)
    return pl.pallas_call(
        kern,
        out_shape=jax.ShapeDtypeStruct((m_pad, cp), out_dtype),
        grid=(m_pad // tile_m,),
        in_specs=in_specs,
        out_specs=pl.BlockSpec((tile_m, cp), lambda i: (i, 0)),
        compiler_params=pltpu.CompilerParams(
            dimension_semantics=("parallel",),
            vmem_limit_bytes=_vmem_limit_bytes()),
    )(*args)


# ------------------------------ fused op wrapper ---------------------------- #
def fused_conv_bn(patches, w2d, gamma, beta, residual, apply_relu,
                  out_dtype=jnp.float32, tile_m_target=512):
    """maybe_relu(BN_train(patches @ w2d) [+ residual]) -> (M, Cout).

    Conv bias is intentionally omitted: training-mode BN subtracts the batch
    mean, so a per-channel bias cancels exactly.
    """
    m, k = patches.shape
    cout = w2d.shape[1]

    cp = _round_up(cout, 128)                     # lane-dense output columns
    tile_n = _pick_tile_n(cp)
    tile_m = _round_up(m, 8) if m <= tile_m_target else tile_m_target
    m_pad = _round_up(m, tile_m)

    # bf16 MXU operands.  Only M rows / Cout lanes are zero-padded (they add 0
    # to the matmul and to the BN sums; the mean/var divisor uses the true M).
    a = jnp.pad(patches.astype(jnp.bfloat16), ((0, m_pad - m), (0, 0)))
    w = jnp.pad(w2d.astype(jnp.bfloat16), ((0, 0), (0, cp - cout)))

    y, stats = _conv_stats(a, w, tile_m, tile_n)

    # Tiny partial-stats reduction + folded scale/shift (hoisted out of the
    # mem-bound per-tile pass).  Padded channels have gamma=0 -> scale/shift=0.
    s = jnp.sum(stats, axis=0)                    # (2, cp)
    mean = s[0] / m
    var = jnp.maximum(s[1] / m - mean * mean, 0.0)
    gamma_p = jnp.pad(gamma.reshape(-1).astype(jnp.float32), (0, cp - cout))
    beta_p = jnp.pad(beta.reshape(-1).astype(jnp.float32), (0, cp - cout))
    scale = gamma_p * jax.lax.rsqrt(var + BN_EPS)
    shift = beta_p - mean * scale
    scale_shift = jnp.stack([scale, shift], axis=0)   # (2, cp) f32

    res_p = None
    if residual is not None:
        res_p = jnp.pad(residual.astype(jnp.bfloat16),
                        ((0, m_pad - m), (0, cp - cout)))

    out = _bn_apply(y, scale_shift, res_p, apply_relu, tile_m, out_dtype)
    return out[:m, :cout]


# ------------------------------- JAX glue ----------------------------------- #
def im2col(x, ksize, stride, pad):
    """x: (N,H,W,C) NHWC -> (N*Hout*Wout, ksize*ksize*C) patches (same dtype)."""
    n, h, w, c = x.shape
    xp = jnp.pad(x, ((0, 0), (pad, pad), (pad, pad), (0, 0)))
    hout = (h + 2 * pad - ksize) // stride + 1
    wout = (w + 2 * pad - ksize) // stride + 1
    cols = []
    for dy in range(ksize):
        for dx in range(ksize):
            cols.append(xp[:, dy:dy + stride * hout:stride,
                           dx:dx + stride * wout:stride, :])
    patches = jnp.stack(cols, axis=3)             # (N, Hout, Wout, k*k, C)
    return patches.reshape(n * hout * wout, ksize * ksize * c), hout, wout


def residual_block_forward(x_nchw, params, *, stride):
    x = jnp.transpose(x_nchw, (0, 2, 3, 1))       # NCHW -> NHWC
    n, h, w, cin = x.shape
    cout = params["w1"].shape[-1]
    xb = x.astype(jnp.bfloat16)                   # bf16 activations for the MXU

    # conv1 + bn1 + relu  (intermediate activation kept in bf16)
    a1, hout, wout = im2col(xb, 3, stride, 1)
    y1 = fused_conv_bn(a1, params["w1"].reshape(-1, cout),
                       params["g1"], params["beta1"], None,
                       apply_relu=True, out_dtype=jnp.bfloat16)
    y1_img = y1.reshape(n, hout, wout, cout)

    # skip path: 1x1 conv + BN when shape changes, identity otherwise
    if stride != 1 or cin != cout:
        a_s, _, _ = im2col(xb, 1, stride, 0)
        skip = fused_conv_bn(a_s, params["ws"].reshape(-1, cout),
                             params["gs"], params["betas"], None,
                             apply_relu=False, out_dtype=jnp.bfloat16)
    else:
        skip = xb.reshape(-1, cout)

    # conv2 + bn2 + residual add + relu  (final output in f32)
    a2, _, _ = im2col(y1_img, 3, 1, 1)
    y2 = fused_conv_bn(a2, params["w2"].reshape(-1, cout),
                       params["g2"], params["beta2"], skip,
                       apply_relu=True, out_dtype=jnp.float32)
    out = y2.reshape(n, hout, wout, cout)
    return jnp.transpose(out, (0, 3, 1, 2))       # back to NCHW


# ----------------------------- reference (JAX) ------------------------------ #
def _ref_conv(x, w, b, stride, pad):
    y = jax.lax.conv_general_dilated(
        x, w, (stride, stride), [(pad, pad), (pad, pad)],
        dimension_numbers=("NHWC", "HWIO", "NHWC"))
    return y + b.reshape(1, 1, 1, -1)


def _ref_bn(x, g, beta):
    mean = jnp.mean(x, axis=(0, 1, 2), keepdims=True)
    var = jnp.mean((x - mean) ** 2, axis=(0, 1, 2), keepdims=True)
    return (g.reshape(1, 1, 1, -1) * (x - mean) * jax.lax.rsqrt(var + BN_EPS)
            + beta.reshape(1, 1, 1, -1))


def ref_forward(x_nchw, params, stride):
    x = jnp.transpose(x_nchw, (0, 2, 3, 1))
    out = jnp.maximum(_ref_bn(_ref_conv(x, params["w1"], params["b1"][0],
                                        stride, 1),
                              params["g1"][0], params["beta1"][0]), 0.0)
    out = _ref_bn(_ref_conv(out, params["w2"], params["b2"][0], 1, 1),
                  params["g2"][0], params["beta2"][0])
    cin, cout = x.shape[-1], params["w1"].shape[-1]
    if stride != 1 or cin != cout:
        skip = _ref_bn(_ref_conv(x, params["ws"], params["bs"][0], stride, 0),
                       params["gs"][0], params["betas"][0])
    else:
        skip = x
    out = jnp.maximum(out + skip, 0.0)
    return jnp.transpose(out, (0, 3, 1, 2))


# ---------------------------------- main ------------------------------------ #
def make_params(key, cin, cout):
    ks = jax.random.split(key, 12)
    return {
        # conv weights stored as (kH, kW, Cin, Cout); biases kept only for the
        # reference (they cancel exactly under training-mode BN).
        "w1": 0.1 * jax.random.normal(ks[0], (3, 3, cin, cout), jnp.float32),
        "b1": 0.1 * jax.random.normal(ks[1], (1, cout), jnp.float32),
        "g1": 1.0 + 0.1 * jax.random.normal(ks[2], (1, cout), jnp.float32),
        "beta1": 0.1 * jax.random.normal(ks[3], (1, cout), jnp.float32),
        "w2": 0.1 * jax.random.normal(ks[4], (3, 3, cout, cout), jnp.float32),
        "b2": 0.1 * jax.random.normal(ks[5], (1, cout), jnp.float32),
        "g2": 1.0 + 0.1 * jax.random.normal(ks[6], (1, cout), jnp.float32),
        "beta2": 0.1 * jax.random.normal(ks[7], (1, cout), jnp.float32),
        "ws": 0.1 * jax.random.normal(ks[8], (1, 1, cin, cout), jnp.float32),
        "bs": 0.1 * jax.random.normal(ks[9], (1, cout), jnp.float32),
        "gs": 1.0 + 0.1 * jax.random.normal(ks[10], (1, cout), jnp.float32),
        "betas": 0.1 * jax.random.normal(ks[11], (1, cout), jnp.float32),
    }


if __name__ == "__main__":
    key = jax.random.PRNGKey(0)
    kx, kp = jax.random.split(key)

    N, CIN, H, W = 2, 4, 16, 16
    COUT, STRIDE = 8, 2                      # stride!=1 -> skip conv path active

    x = jax.random.normal(kx, (N, CIN, H, W), jnp.float32)
    params = make_params(kp, CIN, COUT)

    fwd = jax.jit(residual_block_forward, static_argnames=("stride",))
    out = jax.block_until_ready(fwd(x, params, stride=STRIDE))

    ref = jax.block_until_ready(ref_forward(x, params, STRIDE))

    assert out.shape == (N, COUT, H // STRIDE, W // STRIDE), out.shape
    assert bool(jnp.all(jnp.isfinite(out)))
    # bf16 MXU inputs + bf16 intermediate activations (f32 accumulation and BN
    # math) -> ~1-2% error vs the f32 reference.
    np.testing.assert_allclose(np.asarray(out), np.asarray(ref),
                               atol=6e-2, rtol=6e-2)
    print("KERNEL_OK")
</pallas_src>

<mosaic_0001>
module attributes {stable_mosaic.version = 11 : i64} {
  func.func @_conv_stats_kernel(%arg0: i32, %arg1: i32, %arg2: memref<128x36xbf16, #tpu.memory_space<vmem>>, %arg3: memref<36x128xbf16, #tpu.memory_space<vmem>>, %arg4: memref<128x128xbf16, #tpu.memory_space<vmem>>, %arg5: memref<1x2x128xf32, #tpu.memory_space<vmem>>) attributes {dimension_semantics = [#tpu.dimension_semantics<parallel>, #tpu.dimension_semantics<parallel>], iteration_bounds = array<i64: 1, 1>, scalar_prefetch = 0 : i64, scratch_operands = 0 : i64, tpu.core_type = #tpu.core_type<tc>, window_params = [{transform_indices = @transform_0, window_bounds = array<i64: 128, 36>}, {transform_indices = @transform_1, window_bounds = array<i64: 36, 128>}, {transform_indices = @transform_2, window_bounds = array<i64: 128, 128>}, {transform_indices = @transform_3, window_bounds = array<i64: 1, 2, 128>}]} {
    %c0 = arith.constant 0 : index
    %c0_0 = arith.constant 0 : index
    %0 = vector.load %arg2[%c0, %c0_0] : memref<128x36xbf16, #tpu.memory_space<vmem>>, vector<128x36xbf16>
    %c0_1 = arith.constant 0 : index
    %c0_2 = arith.constant 0 : index
    %1 = vector.load %arg3[%c0_1, %c0_2] : memref<36x128xbf16, #tpu.memory_space<vmem>>, vector<36x128xbf16>
    %cst = arith.constant dense<0.000000e+00> : vector<128x128xf32>
    %2 = tpu.matmul %0, %1, %cst {dimension_numbers = #tpu.dot_dimension_numbers<[1], [0], [0], [1], [0, 0, 1, 1], [], []>} : vector<128x36xbf16>, vector<36x128xbf16>, vector<128x128xf32> -> vector<128x128xf32>
    %3 = arith.truncf %2 : vector<128x128xf32> to vector<128x128xbf16>
    %c0_3 = arith.constant 0 : index
    %c0_4 = arith.constant 0 : index
    %4 = vector.load %arg4[%c0_3, %c0_4] : memref<128x128xbf16, #tpu.memory_space<vmem>>, vector<128x128xbf16>
    tpu.vector_store %arg4[%c0_3, %c0_4], %3 {strides = array<i32>} : memref<128x128xbf16, #tpu.memory_space<vmem>>, vector<128x128xbf16>,
    %cst_5 = arith.constant dense<0.000000e+00> : vector<128xf32>
    %5 = vector.multi_reduction <add>, %2, %cst_5 [0] : vector<128x128xf32> to vector<128xf32>
    %6 = vector.shape_cast %5 : vector<128xf32> to vector<1x128xf32>
    %c0_6 = arith.constant 0 : index
    %c0_7 = arith.constant 0 : index
    %c0_8 = arith.constant 0 : index
    %7 = vector.load %arg5[%c0_6, %c0_7, %c0_8] : memref<1x2x128xf32, #tpu.memory_space<vmem>>, vector<1x1x128xf32>
    %8 = vector.shape_cast %7 : vector<1x1x128xf32> to vector<1x128xf32>
    %9 = vector.shape_cast %6 : vector<1x128xf32> to vector<1x1x128xf32>
    tpu.vector_store %arg5[%c0_6, %c0_7, %c0_8], %9 {strides = array<i32>} : memref<1x2x128xf32, #tpu.memory_space<vmem>>, vector<1x1x128xf32>,
    %10 = arith.mulf %2, %2 : vector<128x128xf32>
    %cst_9 = arith.constant dense<0.000000e+00> : vector<128xf32>
    %11 = vector.multi_reduction <add>, %10, %cst_9 [0] : vector<128x128xf32> to vector<128xf32>
    %12 = vector.shape_cast %11 : vector<128xf32> to vector<1x128xf32>
    %c0_10 = arith.constant 0 : index
    %c1 = arith.constant 1 : index
    %c0_11 = arith.constant 0 : index
    %13 = vector.load %arg5[%c0_10, %c1, %c0_11] : memref<1x2x128xf32, #tpu.memory_space<vmem>>, vector<1x1x128xf32>
    %14 = vector.shape_cast %13 : vector<1x1x128xf32> to vector<1x128xf32>
    %15 = vector.shape_cast %12 : vector<1x128xf32> to vector<1x1x128xf32>
    tpu.vector_store %arg5[%c0_10, %c1, %c0_11], %15 {strides = array<i32>} : memref<1x2x128xf32, #tpu.memory_space<vmem>>, vector<1x1x128xf32>,
    return
  }
  func.func @transform_0(%arg0: i32, %arg1: i32) -> (i32, i32) {
    %c0_i32 = arith.constant 0 : i32
    %c0_i32_0 = arith.constant 0 : i32
    return %arg0, %c0_i32 : i32, i32
  }
  func.func @transform_1(%arg0: i32, %arg1: i32) -> (i32, i32) {
    %c0_i32 = arith.constant 0 : i32
    %c0_i32_0 = arith.constant 0 : i32
    return %c0_i32, %arg1 : i32, i32
  }
  func.func @transform_2(%arg0: i32, %arg1: i32) -> (i32, i32) {
    %c0_i32 = arith.constant 0 : i32
    return %arg0, %arg1 : i32, i32
  }
  func.func @transform_3(%arg0: i32, %arg1: i32) -> (i32, i32, i32) {
    %c0_i32 = arith.constant 0 : i32
    %c0_i32_0 = arith.constant 0 : i32
    return %arg0, %c0_i32, %arg1 : i32, i32, i32
  }
}

module attributes {stable_mosaic.version = 11 : i64} {
  func.func @_bn_apply_kernel(%arg0: i32, %arg1: memref<128x128xbf16, #tpu.memory_space<vmem>>, %arg2: memref<2x128xf32, #tpu.memory_space<vmem>>, %arg3: memref<128x128xbf16, #tpu.memory_space<vmem>>) attributes {dimension_semantics = [#tpu.dimension_semantics<parallel>], iteration_bounds = array<i64: 1>, scalar_prefetch = 0 : i64, scratch_operands = 0 : i64, tpu.core_type = #tpu.core_type<tc>, window_params = [{transform_indices = @transform_0, window_bounds = array<i64: 128, 128>}, {pipeline_mode = #tpu.pipeline_mode<synchronous>, transform_indices = @transform_1, window_bounds = array<i64: 2, 128>}, {transform_indices = @transform_2, window_bounds = array<i64: 128, 128>}]} {
    %c0 = arith.constant 0 : index
    %c0_0 = arith.constant 0 : index
    %0 = vector.load %arg2[%c0, %c0_0] : memref<2x128xf32, #tpu.memory_space<vmem>>, vector<2x128xf32>
    %c0_1 = arith.constant 0 : index
    %c0_2 = arith.constant 0 : index
    %1 = vector.load %arg1[%c0_1, %c0_2] : memref<128x128xbf16, #tpu.memory_space<vmem>>, vector<128x128xbf16>
    %2 = arith.extf %1 : vector<128x128xbf16> to vector<128x128xf32>
    %3 = vector.extract_strided_slice %0 {offsets = [0, 0], sizes = [1, 128], strides = [1, 1]} : vector<2x128xf32> to vector<1x128xf32>
    %4 = vector.broadcast %3 : vector<1x128xf32> to vector<128x128xf32>
    %5 = arith.mulf %2, %4 : vector<128x128xf32>
    %6 = vector.extract_strided_slice %0 {offsets = [1, 0], sizes = [1, 128], strides = [1, 1]} : vector<2x128xf32> to vector<1x128xf32>
    %7 = vector.broadcast %6 : vector<1x128xf32> to vector<128x128xf32>
    %8 = arith.addf %5, %7 : vector<128x128xf32>
    %cst = arith.constant 0.000000e+00 : f32
    %9 = vector.broadcast %cst : f32 to vector<128x128xf32>
    %10 = arith.maximumf %8, %9 : vector<128x128xf32>
    %11 = arith.truncf %10 : vector<128x128xf32> to vector<128x128xbf16>
    %c0_3 = arith.constant 0 : index
    %c0_4 = arith.constant 0 : index
    %12 = vector.load %arg3[%c0_3, %c0_4] : memref<128x128xbf16, #tpu.memory_space<vmem>>, vector<128x128xbf16>
    tpu.vector_store %arg3[%c0_3, %c0_4], %11 {strides = array<i32>} : memref<128x128xbf16, #tpu.memory_space<vmem>>, vector<128x128xbf16>,
    return
  }
  func.func @transform_0(%arg0: i32) -> (i32, i32) {
    %c0_i32 = arith.constant 0 : i32
    %c0_i32_0 = arith.constant 0 : i32
    return %arg0, %c0_i32 : i32, i32
  }
  func.func @transform_1(%arg0: i32) -> (i32, i32) {
    %c0_i32 = arith.constant 0 : i32
    %c0_i32_0 = arith.constant 0 : i32
    %c0_i32_1 = arith.constant 0 : i32
    return %c0_i32, %c0_i32_0 : i32, i32
  }
  func.func @transform_2(%arg0: i32) -> (i32, i32) {
    %c0_i32 = arith.constant 0 : i32
    %c0_i32_0 = arith.constant 0 : i32
    return %arg0, %c0_i32 : i32, i32
  }
}

module attributes {stable_mosaic.version = 11 : i64} {
  func.func @_conv_stats_kernel(%arg0: i32, %arg1: i32, %arg2: memref<128x72xbf16, #tpu.memory_space<vmem>>, %arg3: memref<72x128xbf16, #tpu.memory_space<vmem>>, %arg4: memref<128x128xbf16, #tpu.memory_space<vmem>>, %arg5: memref<1x2x128xf32, #tpu.memory_space<vmem>>) attributes {dimension_semantics = [#tpu.dimension_semantics<parallel>, #tpu.dimension_semantics<parallel>], iteration_bounds = array<i64: 1, 1>, scalar_prefetch = 0 : i64, scratch_operands = 0 : i64, tpu.core_type = #tpu.core_type<tc>, window_params = [{transform_indices = @transform_0, window_bounds = array<i64: 128, 72>}, {transform_indices = @transform_1, window_bounds = array<i64: 72, 128>}, {transform_indices = @transform_2, window_bounds = array<i64: 128, 128>}, {transform_indices = @transform_3, window_bounds = array<i64: 1, 2, 128>}]} {
    %c0 = arith.constant 0 : index
    %c0_0 = arith.constant 0 : index
    %0 = vector.load %arg2[%c0, %c0_0] : memref<128x72xbf16, #tpu.memory_space<vmem>>, vector<128x72xbf16>
    %c0_1 = arith.constant 0 : index
    %c0_2 = arith.constant 0 : index
    %1 = vector.load %arg3[%c0_1, %c0_2] : memref<72x128xbf16, #tpu.memory_space<vmem>>, vector<72x128xbf16>
    %cst = arith.constant dense<0.000000e+00> : vector<128x128xf32>
    %2 = tpu.matmul %0, %1, %cst {dimension_numbers = #tpu.dot_dimension_numbers<[1], [0], [0], [1], [0, 0, 1, 1], [], []>} : vector<128x72xbf16>, vector<72x128xbf16>, vector<128x128xf32> -> vector<128x128xf32>
    %3 = arith.truncf %2 : vector<128x128xf32> to vector<128x128xbf16>
    %c0_3 = arith.constant 0 : index
    %c0_4 = arith.constant 0 : index
    %4 = vector.load %arg4[%c0_3, %c0_4] : memref<128x128xbf16, #tpu.memory_space<vmem>>, vector<128x128xbf16>
    tpu.vector_store %arg4[%c0_3, %c0_4], %3 {strides = array<i32>} : memref<128x128xbf16, #tpu.memory_space<vmem>>, vector<128x128xbf16>,
    %cst_5 = arith.constant dense<0.000000e+00> : vector<128xf32>
    %5 = vector.multi_reduction <add>, %2, %cst_5 [0] : vector<128x128xf32> to vector<128xf32>
    %6 = vector.shape_cast %5 : vector<128xf32> to vector<1x128xf32>
    %c0_6 = arith.constant 0 : index
    %c0_7 = arith.constant 0 : index
    %c0_8 = arith.constant 0 : index
    %7 = vector.load %arg5[%c0_6, %c0_7, %c0_8] : memref<1x2x128xf32, #tpu.memory_space<vmem>>, vector<1x1x128xf32>
    %8 = vector.shape_cast %7 : vector<1x1x128xf32> to vector<1x128xf32>
    %9 = vector.shape_cast %6 : vector<1x128xf32> to vector<1x1x128xf32>
    tpu.vector_store %arg5[%c0_6, %c0_7, %c0_8], %9 {strides = array<i32>} : memref<1x2x128xf32, #tpu.memory_space<vmem>>, vector<1x1x128xf32>,
    %10 = arith.mulf %2, %2 : vector<128x128xf32>
    %cst_9 = arith.constant dense<0.000000e+00> : vector<128xf32>
    %11 = vector.multi_reduction <add>, %10, %cst_9 [0] : vector<128x128xf32> to vector<128xf32>
    %12 = vector.shape_cast %11 : vector<128xf32> to vector<1x128xf32>
    %c0_10 = arith.constant 0 : index
    %c1 = arith.constant 1 : index
    %c0_11 = arith.constant 0 : index
    %13 = vector.load %arg5[%c0_10, %c1, %c0_11] : memref<1x2x128xf32, #tpu.memory_space<vmem>>, vector<1x1x128xf32>
    %14 = vector.shape_cast %13 : vector<1x1x128xf32> to vector<1x128xf32>
    %15 = vector.shape_cast %12 : vector<1x128xf32> to vector<1x1x128xf32>
    tpu.vector_store %arg5[%c0_10, %c1, %c0_11], %15 {strides = array<i32>} : memref<1x2x128xf32, #tpu.memory_space<vmem>>, vector<1x1x128xf32>,
    return
  }
  func.func @transform_0(%arg0: i32, %arg1: i32) -> (i32, i32) {
    %c0_i32 = arith.constant 0 : i32
    %c0_i32_0 = arith.constant 0 : i32
    return %arg0, %c0_i32 : i32, i32
  }
  func.func @transform_1(%arg0: i32, %arg1: i32) -> (i32, i32) {
    %c0_i32 = arith.constant 0 : i32
    %c0_i32_0 = arith.constant 0 : i32
    return %c0_i32, %arg1 : i32, i32
  }
  func.func @transform_2(%arg0: i32, %arg1: i32) -> (i32, i32) {
    %c0_i32 = arith.constant 0 : i32
    return %arg0, %arg1 : i32, i32
  }
  func.func @transform_3(%arg0: i32, %arg1: i32) -> (i32, i32, i32) {
    %c0_i32 = arith.constant 0 : i32
    %c0_i32_0 = arith.constant 0 : i32
    return %arg0, %c0_i32, %arg1 : i32, i32, i32
  }
}

module attributes {stable_mosaic.version = 11 : i64} {
  func.func @_conv_stats_kernel(%arg0: i32, %arg1: i32, %arg2: memref<128x4xbf16, #tpu.memory_space<vmem>>, %arg3: memref<4x128xbf16, #tpu.memory_space<vmem>>, %arg4: memref<128x128xbf16, #tpu.memory_space<vmem>>, %arg5: memref<1x2x128xf32, #tpu.memory_space<vmem>>) attributes {dimension_semantics = [#tpu.dimension_semantics<parallel>, #tpu.dimension_semantics<parallel>], iteration_bounds = array<i64: 1, 1>, scalar_prefetch = 0 : i64, scratch_operands = 0 : i64, tpu.core_type = #tpu.core_type<tc>, window_params = [{transform_indices = @transform_0, window_bounds = array<i64: 128, 4>}, {transform_indices = @transform_1, window_bounds = array<i64: 4, 128>}, {transform_indices = @transform_2, window_bounds = array<i64: 128, 128>}, {transform_indices = @transform_3, window_bounds = array<i64: 1, 2, 128>}]} {
    %c0 = arith.constant 0 : index
    %c0_0 = arith.constant 0 : index
    %0 = vector.load %arg2[%c0, %c0_0] : memref<128x4xbf16, #tpu.memory_space<vmem>>, vector<128x4xbf16>
    %c0_1 = arith.constant 0 : index
    %c0_2 = arith.constant 0 : index
    %1 = vector.load %arg3[%c0_1, %c0_2] : memref<4x128xbf16, #tpu.memory_space<vmem>>, vector<4x128xbf16>
    %cst = arith.constant dense<0.000000e+00> : vector<128x128xf32>
    %2 = tpu.matmul %0, %1, %cst {dimension_numbers = #tpu.dot_dimension_numbers<[1], [0], [0], [1], [0, 0, 1, 1], [], []>} : vector<128x4xbf16>, vector<4x128xbf16>, vector<128x128xf32> -> vector<128x128xf32>
    %3 = arith.truncf %2 : vector<128x128xf32> to vector<128x128xbf16>
    %c0_3 = arith.constant 0 : index
    %c0_4 = arith.constant 0 : index
    %4 = vector.load %arg4[%c0_3, %c0_4] : memref<128x128xbf16, #tpu.memory_space<vmem>>, vector<128x128xbf16>
    tpu.vector_store %arg4[%c0_3, %c0_4], %3 {strides = array<i32>} : memref<128x128xbf16, #tpu.memory_space<vmem>>, vector<128x128xbf16>,
    %cst_5 = arith.constant dense<0.000000e+00> : vector<128xf32>
    %5 = vector.multi_reduction <add>, %2, %cst_5 [0] : vector<128x128xf32> to vector<128xf32>
    %6 = vector.shape_cast %5 : vector<128xf32> to vector<1x128xf32>
    %c0_6 = arith.constant 0 : index
    %c0_7 = arith.constant 0 : index
    %c0_8 = arith.constant 0 : index
    %7 = vector.load %arg5[%c0_6, %c0_7, %c0_8] : memref<1x2x128xf32, #tpu.memory_space<vmem>>, vector<1x1x128xf32>
    %8 = vector.shape_cast %7 : vector<1x1x128xf32> to vector<1x128xf32>
    %9 = vector.shape_cast %6 : vector<1x128xf32> to vector<1x1x128xf32>
    tpu.vector_store %arg5[%c0_6, %c0_7, %c0_8], %9 {strides = array<i32>} : memref<1x2x128xf32, #tpu.memory_space<vmem>>, vector<1x1x128xf32>,
    %10 = arith.mulf %2, %2 : vector<128x128xf32>
    %cst_9 = arith.constant dense<0.000000e+00> : vector<128xf32>
    %11 = vector.multi_reduction <add>, %10, %cst_9 [0] : vector<128x128xf32> to vector<128xf32>
    %12 = vector.shape_cast %11 : vector<128xf32> to vector<1x128xf32>
    %c0_10 = arith.constant 0 : index
    %c1 = arith.constant 1 : index
    %c0_11 = arith.constant 0 : index
    %13 = vector.load %arg5[%c0_10, %c1, %c0_11] : memref<1x2x128xf32, #tpu.memory_space<vmem>>, vector<1x1x128xf32>
    %14 = vector.shape_cast %13 : vector<1x1x128xf32> to vector<1x128xf32>
    %15 = vector.shape_cast %12 : vector<1x128xf32> to vector<1x1x128xf32>
    tpu.vector_store %arg5[%c0_10, %c1, %c0_11], %15 {strides = array<i32>} : memref<1x2x128xf32, #tpu.memory_space<vmem>>, vector<1x1x128xf32>,
    return
  }
  func.func @transform_0(%arg0: i32, %arg1: i32) -> (i32, i32) {
    %c0_i32 = arith.constant 0 : i32
    %c0_i32_0 = arith.constant 0 : i32
    return %arg0, %c0_i32 : i32, i32
  }
  func.func @transform_1(%arg0: i32, %arg1: i32) -> (i32, i32) {
    %c0_i32 = arith.constant 0 : i32
    %c0_i32_0 = arith.constant 0 : i32
    return %c0_i32, %arg1 : i32, i32
  }
  func.func @transform_2(%arg0: i32, %arg1: i32) -> (i32, i32) {
    %c0_i32 = arith.constant 0 : i32
    return %arg0, %arg1 : i32, i32
  }
  func.func @transform_3(%arg0: i32, %arg1: i32) -> (i32, i32, i32) {
    %c0_i32 = arith.constant 0 : i32
    %c0_i32_0 = arith.constant 0 : i32
    return %arg0, %c0_i32, %arg1 : i32, i32, i32
  }
}

module attributes {stable_mosaic.version = 11 : i64} {
  func.func @_bn_apply_kernel(%arg0: i32, %arg1: memref<128x128xbf16, #tpu.memory_space<vmem>>, %arg2: memref<2x128xf32, #tpu.memory_space<vmem>>, %arg3: memref<128x128xbf16, #tpu.memory_space<vmem>>) attributes {dimension_semantics = [#tpu.dimension_semantics<parallel>], iteration_bounds = array<i64: 1>, scalar_prefetch = 0 : i64, scratch_operands = 0 : i64, tpu.core_type = #tpu.core_type<tc>, window_params = [{transform_indices = @transform_0, window_bounds = array<i64: 128, 128>}, {pipeline_mode = #tpu.pipeline_mode<synchronous>, transform_indices = @transform_1, window_bounds = array<i64: 2, 128>}, {transform_indices = @transform_2, window_bounds = array<i64: 128, 128>}]} {
    %c0 = arith.constant 0 : index
    %c0_0 = arith.constant 0 : index
    %0 = vector.load %arg2[%c0, %c0_0] : memref<2x128xf32, #tpu.memory_space<vmem>>, vector<2x128xf32>
    %c0_1 = arith.constant 0 : index
    %c0_2 = arith.constant 0 : index
    %1 = vector.load %arg1[%c0_1, %c0_2] : memref<128x128xbf16, #tpu.memory_space<vmem>>, vector<128x128xbf16>
    %2 = arith.extf %1 : vector<128x128xbf16> to vector<128x128xf32>
    %3 = vector.extract_strided_slice %0 {offsets = [0, 0], sizes = [1, 128], strides = [1, 1]} : vector<2x128xf32> to vector<1x128xf32>
    %4 = vector.broadcast %3 : vector<1x128xf32> to vector<128x128xf32>
    %5 = arith.mulf %2, %4 : vector<128x128xf32>
    %6 = vector.extract_strided_slice %0 {offsets = [1, 0], sizes = [1, 128], strides = [1, 1]} : vector<2x128xf32> to vector<1x128xf32>
    %7 = vector.broadcast %6 : vector<1x128xf32> to vector<128x128xf32>
    %8 = arith.addf %5, %7 : vector<128x128xf32>
    %9 = arith.truncf %8 : vector<128x128xf32> to vector<128x128xbf16>
    %c0_3 = arith.constant 0 : index
    %c0_4 = arith.constant 0 : index
    %10 = vector.load %arg3[%c0_3, %c0_4] : memref<128x128xbf16, #tpu.memory_space<vmem>>, vector<128x128xbf16>
    tpu.vector_store %arg3[%c0_3, %c0_4], %9 {strides = array<i32>} : memref<128x128xbf16, #tpu.memory_space<vmem>>, vector<128x128xbf16>,
    return
  }
  func.func @transform_0(%arg0: i32) -> (i32, i32) {
    %c0_i32 = arith.constant 0 : i32
    %c0_i32_0 = arith.constant 0 : i32
    return %arg0, %c0_i32 : i32, i32
  }
  func.func @transform_1(%arg0: i32) -> (i32, i32) {
    %c0_i32 = arith.constant 0 : i32
    %c0_i32_0 = arith.constant 0 : i32
    %c0_i32_1 = arith.constant 0 : i32
    return %c0_i32, %c0_i32_0 : i32, i32
  }
  func.func @transform_2(%arg0: i32) -> (i32, i32) {
    %c0_i32 = arith.constant 0 : i32
    %c0_i32_0 = arith.constant 0 : i32
    return %arg0, %c0_i32 : i32, i32
  }
}

module attributes {stable_mosaic.version = 11 : i64} {
  func.func @_bn_apply_kernel(%arg0: i32, %arg1: memref<128x128xbf16, #tpu.memory_space<vmem>>, %arg2: memref<2x128xf32, #tpu.memory_space<vmem>>, %arg3: memref<128x128xbf16, #tpu.memory_space<vmem>>, %arg4: memref<128x128xf32, #tpu.memory_space<vmem>>) attributes {dimension_semantics = [#tpu.dimension_semantics<parallel>], iteration_bounds = array<i64: 1>, scalar_prefetch = 0 : i64, scratch_operands = 0 : i64, tpu.core_type = #tpu.core_type<tc>, window_params = [{transform_indices = @transform_0, window_bounds = array<i64: 128, 128>}, {pipeline_mode = #tpu.pipeline_mode<synchronous>, transform_indices = @transform_1, window_bounds = array<i64: 2, 128>}, {transform_indices = @transform_2, window_bounds = array<i64: 128, 128>}, {transform_indices = @transform_3, window_bounds = array<i64: 128, 128>}]} {
    %c0 = arith.constant 0 : index
    %c0_0 = arith.constant 0 : index
    %0 = vector.load %arg2[%c0, %c0_0] : memref<2x128xf32, #tpu.memory_space<vmem>>, vector<2x128xf32>
    %c0_1 = arith.constant 0 : index
    %c0_2 = arith.constant 0 : index
    %1 = vector.load %arg1[%c0_1, %c0_2] : memref<128x128xbf16, #tpu.memory_space<vmem>>, vector<128x128xbf16>
    %2 = arith.extf %1 : vector<128x128xbf16> to vector<128x128xf32>
    %3 = vector.extract_strided_slice %0 {offsets = [0, 0], sizes = [1, 128], strides = [1, 1]} : vector<2x128xf32> to vector<1x128xf32>
    %4 = vector.broadcast %3 : vector<1x128xf32> to vector<128x128xf32>
    %5 = arith.mulf %2, %4 : vector<128x128xf32>
    %6 = vector.extract_strided_slice %0 {offsets = [1, 0], sizes = [1, 128], strides = [1, 1]} : vector<2x128xf32> to vector<1x128xf32>
    %7 = vector.broadcast %6 : vector<1x128xf32> to vector<128x128xf32>
    %8 = arith.addf %5, %7 : vector<128x128xf32>
    %c0_3 = arith.constant 0 : index
    %c0_4 = arith.constant 0 : index
    %9 = vector.load %arg3[%c0_3, %c0_4] : memref<128x128xbf16, #tpu.memory_space<vmem>>, vector<128x128xbf16>
    %10 = arith.extf %9 : vector<128x128xbf16> to vector<128x128xf32>
    %11 = arith.addf %8, %10 : vector<128x128xf32>
    %cst = arith.constant 0.000000e+00 : f32
    %12 = vector.broadcast %cst : f32 to vector<128x128xf32>
    %13 = arith.maximumf %11, %12 : vector<128x128xf32>
    %c0_5 = arith.constant 0 : index
    %c0_6 = arith.constant 0 : index
    %14 = vector.load %arg4[%c0_5, %c0_6] : memref<128x128xf32, #tpu.memory_space<vmem>>, vector<128x128xf32>
    tpu.vector_store %arg4[%c0_5, %c0_6], %13 {strides = array<i32>} : memref<128x128xf32, #tpu.memory_space<vmem>>, vector<128x128xf32>,
    return
  }
  func.func @transform_0(%arg0: i32) -> (i32, i32) {
    %c0_i32 = arith.constant 0 : i32
    %c0_i32_0 = arith.constant 0 : i32
    return %arg0, %c0_i32 : i32, i32
  }
  func.func @transform_1(%arg0: i32) -> (i32, i32) {
    %c0_i32 = arith.constant 0 : i32
    %c0_i32_0 = arith.constant 0 : i32
    %c0_i32_1 = arith.constant 0 : i32
    return %c0_i32, %c0_i32_0 : i32, i32
  }
  func.func @transform_2(%arg0: i32) -> (i32, i32) {
    %c0_i32 = arith.constant 0 : i32
    %c0_i32_0 = arith.constant 0 : i32
    return %arg0, %c0_i32 : i32, i32
  }
  func.func @transform_3(%arg0: i32) -> (i32, i32) {
    %c0_i32 = arith.constant 0 : i32
    %c0_i32_0 = arith.constant 0 : i32
    return %arg0, %c0_i32 : i32, i32
  }
}

</mosaic_0001>

<bundles_post_ra>
// kernel: residual_block_forward.7
= control target key start
LH: loop header
LB: loop body
LE: loop exit
PB: predicated region body
PF: predicated region fallthrough
CT: control target
= control target key end

     0   :  { %v44_v0 = vlaneseq  ;;  %s368_s0 = inlined_call_operand.vmem [shape: bf16[128,128], index: 0, kind: input, shape index: {}]   ;;  %s369_s1 = inlined_call_operand.vmem [shape: f32[2,128], index: 1, kind: input, shape index: {}]   ;;  %s370_s2 = inlined_call_operand.vmem [shape: bf16[128,128], index: 2, kind: output, shape index: {}]  }
   0x1   :  { %v217_v1 = vld [vmem:[%s368_s0] sm:$0xff]   ;;  %v288_v2 = vld [vmem:[%s368_s0 + $0x8] sm:$0xff]   ;;  %v289_v4 = vld [vmem:[%s368_s0 + $0x10] sm:$0xff]  }
   0x2   :  { %v45_v3 = vshrl.u32 %v44_v0, 7  ;;  %v290_v5 = vld [vmem:[%s368_s0 + $0x18] sm:$0xff]   ;;  %v291_v6 = vld [vmem:[%s368_s0 + $0x20] sm:$0xff]   ;;  %v218_v8 = vunpack.c.l.bf16 %v217_v1  ;;  %v219_v9 = vunpack.c.h.bf16 %v217_v1  ;;  %v222_v10 = vunpack.c.l.bf16 %v288_v2  ;;  %v292_v12 = vld [vmem:[%s368_s0 + $0x28] sm:$0xff]  }
   0x3   :  { %v11_v7 = vld [vmem:[%s369_s1] sm:$0x3]  ;;  %v223_v11 = vunpack.c.h.bf16 %v288_v2  ;;  %v226_v15 = vunpack.c.l.bf16 %v289_v4  ;;  %v227_v16 = vunpack.c.h.bf16 %v289_v4  ;;  %v293_v17 = vld [vmem:[%s368_s0 + $0x30] sm:$0xff]   ;;  %v294_v18 = vld [vmem:[%s368_s0 + $0x38] sm:$0xff]   ;;  %v230_v19 = vunpack.c.l.bf16 %v290_v5 }
   0x4   :  { %v46_v13 = vsub.s32 0, %v45_v3  ;;  %v66_v14 = vsub.s32 1, %v45_v3  ;;  %v231_v20 = vunpack.c.h.bf16 %v290_v5  ;;  %v234_v21 = vunpack.c.l.bf16 %v291_v6 }
   0x5   :  { %v235_v22 = vunpack.c.h.bf16 %v291_v6  ;;  %v238_v25 = vunpack.c.l.bf16 %v292_v12  ;;  %v239_v26 = vunpack.c.h.bf16 %v292_v12  ;;  %v242_v27 = vunpack.c.l.bf16 %v293_v17 }
   0x6   :  { %v47_v23 = vrot.slane %v11_v7, %v46_v13  ;;  %v67_v24 = vrot.slane %v11_v7, %v66_v14  ;;  %v243_v28 = vunpack.c.h.bf16 %v293_v17  ;;  %v246_v29 = vunpack.c.l.bf16 %v294_v18 }
   0x7   :  { %v247_v30 = vunpack.c.h.bf16 %v294_v18 }
   0x8   :  { %v48_v31 = vmul.f32 %v218_v8, %v47_v23  ;;  %v49_v32 = vmul.f32 %v219_v9, %v47_v23  ;;  %v50_v33 = vmul.f32 %v222_v10, %v47_v23  ;;  %v51_v34 = vmul.f32 %v223_v11, %v47_v23 }
   0x9   :  { %v52_v35 = vmul.f32 %v226_v15, %v47_v23  ;;  %v53_v36 = vmul.f32 %v227_v16, %v47_v23  ;;  %v54_v37 = vmul.f32 %v230_v19, %v47_v23  ;;  %v55_v38 = vmul.f32 %v231_v20, %v47_v23 }
   0xa   :  { %v68_v39 = vadd.f32 %v67_v24, %v48_v31  ;;  %v69_v40 = vadd.f32 %v67_v24, %v49_v32  ;;  %v70_v41 = vadd.f32 %v67_v24, %v50_v33  ;;  %v71_v42 = vadd.f32 %v67_v24, %v51_v34 }
   0xb   :  { %v72_v43 = vadd.f32 %v67_v24, %v52_v35  ;;  %v73_v44 = vadd.f32 %v67_v24, %v53_v36  ;;  %v74_v45 = vadd.f32 %v67_v24, %v54_v37  ;;  %v75_v46 = vadd.f32 %v67_v24, %v55_v38 }
   0xc   :  { %v84_v47 = vmax.f32 %v68_v39, 0.0  ;;  %v85_v48 = vmax.f32 %v69_v40, 0.0  ;;  %v86_v49 = vmax.f32 %v70_v41, 0.0  ;;  %v87_v50 = vmax.f32 %v71_v42, 0.0 }
   0xd   :  { %v88_v51 = vmax.f32 %v72_v43, 0.0  ;;  %v89_v52 = vmax.f32 %v73_v44, 0.0  ;;  %v90_v53 = vmax.f32 %v74_v45, 0.0  ;;  %v91_v54 = vmax.f32 %v75_v46, 0.0 }
   0xe   :  { %v251_v55 = vpack.c.bf16 %v85_v48, %v84_v47  ;;  %v256_v56 = vpack.c.bf16 %v87_v50, %v86_v49  ;;  %v56_v57 = vmul.f32 %v234_v21, %v47_v23  ;;  %v57_v58 = vmul.f32 %v235_v22, %v47_v23 }
   0xf   :  { %v261_v59 = vpack.c.bf16 %v89_v52, %v88_v51  ;;  %v266_v60 = vpack.c.bf16 %v91_v54, %v90_v53  ;;  %v58_v61 = vmul.f32 %v238_v25, %v47_v23  ;;  %v59_v62 = vmul.f32 %v239_v26, %v47_v23 }
  0x10   :  { %252 = vst [vmem:[%s370_s2] sm:$0xff] %v251_v55   ;;  %295 = vst [vmem:[%s370_s2 + $0x8] sm:$0xff] %v256_v56   ;;  %v76_v63 = vadd.f32 %v67_v24, %v56_v57  ;;  %v77_v0 = vadd.f32 %v67_v24, %v57_v58  ;;  %v60_v1 = vmul.f32 %v242_v27, %v47_v23 }
  0x11   :  { %v61_v2 = vmul.f32 %v243_v28, %v47_v23  ;;  %296 = vst [vmem:[%s370_s2 + $0x10] sm:$0xff] %v261_v59   ;;  %297 = vst [vmem:[%s370_s2 + $0x18] sm:$0xff] %v266_v60   ;;  %v78_v3 = vadd.f32 %v67_v24, %v58_v61  ;;  %v79_v4 = vadd.f32 %v67_v24, %v59_v62 }
  0x12   :  { %v62_v5 = vmul.f32 %v246_v29, %v47_v23  ;;  %v63_v6 = vmul.f32 %v247_v30, %v47_v23  ;;  %v92_v7 = vmax.f32 %v76_v63, 0.0  ;;  %v93_v8 = vmax.f32 %v77_v0, 0.0 }
  0x13   :  { %v80_v9 = vadd.f32 %v67_v24, %v60_v1  ;;  %v81_v10 = vadd.f32 %v67_v24, %v61_v2  ;;  %v94_v11 = vmax.f32 %v78_v3, 0.0  ;;  %v95_v12 = vmax.f32 %v79_v4, 0.0 }
  0x14   :  { %v82_v13 = vadd.f32 %v67_v24, %v62_v5  ;;  %v83_v14 = vadd.f32 %v67_v24, %v63_v6  ;;  %v271_v15 = vpack.c.bf16 %v93_v8, %v92_v7 }
  0x15   :  { %v96_v16 = vmax.f32 %v80_v9, 0.0  ;;  %v97_v17 = vmax.f32 %v81_v10, 0.0  ;;  %v276_v18 = vpack.c.bf16 %v95_v12, %v94_v11 }
  0x16   :  { %v98_v19 = vmax.f32 %v82_v13, 0.0  ;;  %v99_v20 = vmax.f32 %v83_v14, 0.0  ;;  %298 = vst [vmem:[%s370_s2 + $0x20] sm:$0xff] %v271_v15  }
  0x17   :  { %v281_v21 = vpack.c.bf16 %v97_v17, %v96_v16  ;;  %299 = vst [vmem:[%s370_s2 + $0x28] sm:$0xff] %v276_v18  }
  0x18   :  { %v286_v22 = vpack.c.bf16 %v99_v20, %v98_v19 }
  0x19   :  { %300 = vst [vmem:[%s370_s2 + $0x30] sm:$0xff] %v281_v21  }
  0x1a   :  { %301 = vst [vmem:[%s370_s2 + $0x38] sm:$0xff] %v286_v22  }

// kernel: residual_block_forward.6
= control target key start
LH: loop header
LB: loop body
LE: loop exit
PB: predicated region body
PF: predicated region fallthrough
CT: control target
= control target key end

     0   :  { %vm90_vm0 = vcmask 293888   ;;  %vm115_vm1 = vcmask 1041408   ;;  %s605_s1 = inlined_call_operand.vmem [shape: bf16[36,128], index: 1, kind: input, shape index: {}]   ;;  %s606_s0 = inlined_call_operand.vmem [shape: bf16[128,36], index: 0, kind: input, shape index: {}]   ;;  %s607_s2 = inlined_call_operand.vmem [shape: bf16[128,128], index: 2, kind: output, shape index: {0}]   ;;  %s608_s3 = inlined_call_operand.vmem [shape: f32[1,2,128], index: 3, kind: output, shape index: {1}]  }
   0x1   :  { %v503_v0 = vld [vmem:[%s605_s1] sm:$0xff]   ;;  %v504_v1 = vld [vmem:[%s605_s1 + $0x8] sm:$0xff]   ;;  %v505_v2 = vld [vmem:[%s605_s1 + $0x10] ss:$0 sps:$4 sm:$0x33]  }
   0x2   :  { %473 = vmatprep.subr.bf16.mxu0 %v503_v0  ;;  %v506_v3 = vld [vmem:[%s606_s0] sm:$0xff]   ;;  %495 = vmatprep.subr.bf16.mxu1 %v503_v0  ;;  %v117_v5 = vsel %vm115_vm1, %v505_v2, 0  ;;  %v507_v6 = vld [vmem:[%s606_s0 + $0x8] sm:$0xff]   ;;  %v508_v8 = vld [vmem:[%s606_s0 + $0x10] sm:$0xff]  }
   0x3   :  { %474 = vmatpush3.bf16.msra.mxu0 %v503_v0  ;;  %498 = vmatpush3.bf16.msra.mxu1 %v503_v0  ;;  %v510_v4 = vld [vmem:[%s606_s0 + $0x20] sm:$0xff]   ;;  %v511_v7 = vld [vmem:[%s606_s0 + $0x28] sm:$0xff]   ;;  %v512_v9 = vld [vmem:[%s606_s0 + $0x30] sm:$0xff]  }
   0x4   :  { %475 = vmatprep.subr.bf16.mxu0 %v504_v1  ;;  %479 = vmatprep.mubr.msk.bf16.mxu0 %vm90_vm0, %v506_v3  ;;  %v509_v10 = vld [vmem:[%s606_s0 + $0x18] sm:$0xff]  }
   0x5   :  { %496 = vmatprep.subr.bf16.mxu1 %v504_v1  ;;  %487 = vmatprep.mubr.msk.bf16.mxu1 %vm90_vm0, %v510_v4  ;;  %v513_v11 = vld [vmem:[%s606_s0 + $0x38] sm:$0xff]  }
   0x7   :  { %476 = vmatpush3.bf16.msra.mxu0 %v504_v1  ;;  %499 = vmatpush3.bf16.msra.mxu1 %v504_v1 }
   0x8   :  { %501 = vmatprep.subr.msk.bf16.mxu0 %vm115_vm1, %v505_v2  ;;  %502 = vmatprep.subr.msk.bf16.mxu1 %vm115_vm1, %v505_v2 }
   0xb   :  { %478 = vmatpush3.bf16.msra.mxu0 %v117_v5  ;;  %500 = vmatpush3.bf16.msra.mxu1 %v117_v5 }
   0xe   :  { %480 = vmatmul.mubr.msk.bf16.vlgmr.msra.gmra.mrb[0].mxu0 %vm90_vm0, %v507_v6  ;;  %488 = vmatmul.mubr.msk.bf16.vlgmr.msra.gmra.mrb[0].mxu1 %vm90_vm0, %v511_v7 }
   0xf   :  { %483 = vmatprep.mubr.msk.bf16.mxu0 %vm90_vm0, %v508_v8  ;;  %491 = vmatprep.mubr.msk.bf16.mxu1 %vm90_vm0, %v512_v9 }
  0x16   :  { %484 = vmatmul.mubr.msk.bf16.gmra.mrb[4].mxu0 %vm90_vm0, %v509_v10  ;;  %492 = vmatmul.mubr.msk.bf16.gmra.mrb[4].mxu1 %vm90_vm0, %v513_v11 }
  0xe1   :  { %v481_v12 = vpop.f32.mrb[0].mxu0  ;;  %v489_v13 = vpop.f32.mrb[0].mxu1 }
  0xe2   :  { %v153_v14 = vpop.f32.mrb[1].mxu0  ;;  %v185_v15 = vpop.f32.mrb[1].mxu1  ;;  %v320_v27 = vmul.f32 %v481_v12, %v481_v12  ;;  %v328_v63 = vmul.f32 %v489_v13, %v489_v13 }
  0xe3   :  { %v482_v16 = vpop.f32.mrb[2].mxu0  ;;  %v490_v17 = vpop.f32.mrb[2].mxu1  ;;  %v318_v18 = vmul.f32 %v153_v14, %v153_v14  ;;  %v326_v57 = vmul.f32 %v185_v15, %v185_v15 }
  0xe4   :  { %v423_v19 = vpack.c.bf16 %v482_v16, %v481_v12  ;;  %v156_v20 = vpop.f32.mrb[3].mxu0  ;;  %v443_v21 = vpack.c.bf16 %v490_v17, %v489_v13  ;;  %v188_v22 = vpop.f32.mrb[3].mxu1  ;;  %v321_v30 = vmul.f32 %v482_v16, %v482_v16  ;;  %v329_v2 = vmul.f32 %v490_v17, %v490_v17 }
  0xe5   :  { %v418_v23 = vpack.c.bf16 %v156_v20, %v153_v14  ;;  %v296_v24 = vadd.f32 %v156_v20, %v153_v14  ;;  %v319_v25 = vmul.f32 %v156_v20, %v156_v20  ;;  %v438_v26 = vpack.c.bf16 %v188_v22, %v185_v15 }
  0xe6   :  { %455 = vst [vmem:[%s607_s2 + $0x8] sm:$0xff] %v423_v19   ;;  %459 = vst [vmem:[%s607_s2 + $0x28] sm:$0xff] %v443_v21   ;;  %v327_v62 = vmul.f32 %v188_v22, %v188_v22 }
  0xe7   :  { %419 = vst [vmem:[%s607_s2] sm:$0xff] %v418_v23   ;;  %v297_v28 = vadd.f32 %v481_v12, %v296_v24  ;;  %v334_v29 = vadd.f32 %v319_v25, %v318_v18  ;;  %458 = vst [vmem:[%s607_s2 + $0x20] sm:$0xff] %v438_v26  }
  0xe9   :  { %v335_v31 = vadd.f32 %v334_v29, %v320_v27  ;;  %v485_v32 = vpop.f32.mrb[4].mxu0  ;;  %v298_v33 = vadd.f32 %v482_v16, %v297_v28  ;;  %v493_v34 = vpop.f32.mrb[4].mxu1 }
  0xea   :  { %v169_v35 = vpop.f32.mrb[5].mxu0  ;;  %v201_v36 = vpop.f32.mrb[5].mxu1  ;;  %v324_v51 = vmul.f32 %v485_v32, %v485_v32  ;;  %v332_v11 = vmul.f32 %v493_v34, %v493_v34 }
  0xeb   :  { %v299_v37 = vadd.f32 %v298_v33, %v169_v35  ;;  %v322_v38 = vmul.f32 %v169_v35, %v169_v35  ;;  %v336_v39 = vadd.f32 %v335_v31, %v321_v30  ;;  %v486_v40 = vpop.f32.mrb[6].mxu0  ;;  %v494_v41 = vpop.f32.mrb[6].mxu1  ;;  %v330_v5 = vmul.f32 %v201_v36, %v201_v36 }
  0xec   :  { %v433_v42 = vpack.c.bf16 %v486_v40, %v485_v32  ;;  %v172_v43 = vpop.f32.mrb[7].mxu0  ;;  %v453_v44 = vpack.c.bf16 %v494_v41, %v493_v34  ;;  %v204_v45 = vpop.f32.mrb[7].mxu1  ;;  %v325_v54 = vmul.f32 %v486_v40, %v486_v40 }
  0xed   :  { %v337_v46 = vadd.f32 %v336_v39, %v322_v38  ;;  %v428_v47 = vpack.c.bf16 %v172_v43, %v169_v35  ;;  %v300_v48 = vadd.f32 %v299_v37, %v172_v43  ;;  %v323_v49 = vmul.f32 %v172_v43, %v172_v43 }
  0xee   :  { %457 = vst [vmem:[%s607_s2 + $0x18] sm:$0xff] %v433_v42   ;;  %461 = vst [vmem:[%s607_s2 + $0x38] sm:$0xff] %v453_v44   ;;  %v448_v50 = vpack.c.bf16 %v204_v45, %v201_v36  ;;  %v331_v10 = vmul.f32 %v204_v45, %v204_v45 }
  0xef   :  { %456 = vst [vmem:[%s607_s2 + $0x10] sm:$0xff] %v428_v47   ;;  %v301_v52 = vadd.f32 %v485_v32, %v300_v48  ;;  %v338_v53 = vadd.f32 %v337_v46, %v323_v49 }
  0xf0   :  { %460 = vst [vmem:[%s607_s2 + $0x30] sm:$0xff] %v448_v50  }
  0xf1   :  { %v339_v55 = vadd.f32 %v338_v53, %v324_v51  ;;  %v302_v56 = vadd.f32 %v486_v40, %v301_v52 }
  0xf3   :  { %v303_v58 = vadd.f32 %v302_v56, %v185_v15  ;;  %v340_v59 = vadd.f32 %v339_v55, %v325_v54  ;;  %v333_v15 = vmul.f32 %v494_v41, %v494_v41 }
  0xf5   :  { %v341_v60 = vadd.f32 %v340_v59, %v326_v57  ;;  %v304_v61 = vadd.f32 %v303_v58, %v188_v22 }
  0xf7   :  { %v305_v0 = vadd.f32 %v489_v13, %v304_v61  ;;  %v342_v1 = vadd.f32 %v341_v60, %v327_v62 }
  0xf9   :  { %v343_v3 = vadd.f32 %v342_v1, %v328_v63  ;;  %v306_v4 = vadd.f32 %v490_v17, %v305_v0 }
  0xfb   :  { %v307_v6 = vadd.f32 %v306_v4, %v201_v36  ;;  %v344_v7 = vadd.f32 %v343_v3, %v329_v2 }
  0xfd   :  { %v345_v8 = vadd.f32 %v344_v7, %v330_v5  ;;  %v308_v9 = vadd.f32 %v307_v6, %v204_v45 }
  0xff   :  { %v309_v12 = vadd.f32 %v493_v34, %v308_v9  ;;  %v346_v14 = vadd.f32 %v345_v8, %v331_v10 }
 0x101   :  { %v310_v16 = vadd.f32 %v494_v41, %v309_v12  ;;  %v347_v18 = vadd.f32 %v346_v14, %v332_v11 }
 0x103   :  { %v311_v19 = vrot.slane %v310_v16, 4  ;;  %v348_v20 = vadd.f32 %v347_v18, %v333_v15 }
 0x105   :  { %v312_v21 = vadd.f32 %v311_v19, %v310_v16  ;;  %v349_v13 = vrot.slane %v348_v20, 4 }
 0x107   :  { %v313_v22 = vrot.slane %v312_v21, 2  ;;  %v350_v23 = vadd.f32 %v349_v13, %v348_v20 }
 0x109   :  { %v314_v24 = vadd.f32 %v313_v22, %v312_v21  ;;  %v351_v17 = vrot.slane %v350_v23, 2 }
 0x10b   :  { %v315_v25 = vrot.slane %v314_v24, 1  ;;  %v352_v26 = vadd.f32 %v351_v17, %v350_v23 }
 0x10d   :  { %v316_v27 = vadd.f32 %v315_v25, %v314_v24  ;;  %v353_v28 = vrot.slane %v352_v26, 1 }
 0x10f   :  { %317 = vst [vmem:[%s608_s3] sm:$0x1] %v316_v27  ;;  %v354_v29 = vadd.f32 %v353_v28, %v352_v26 }
 0x111   :  { %355 = vst [vmem:[%s608_s3 + $0x1] sm:$0x1] %v354_v29 }

// kernel: residual_block_forward.10
= control target key start
LH: loop header
LB: loop body
LE: loop exit
PB: predicated region body
PF: predicated region fallthrough
CT: control target
= control target key end

     0   :  { %vm106_vm0 = vcmask 588800   ;;  %vm131_vm1 = vcmask 1043456   ;;  %s641_s1 = inlined_call_operand.vmem [shape: bf16[72,128], index: 1, kind: input, shape index: {}]   ;;  %s642_s0 = inlined_call_operand.vmem [shape: bf16[128,72], index: 0, kind: input, shape index: {}]   ;;  %s643_s2 = inlined_call_operand.vmem [shape: bf16[128,128], index: 2, kind: output, shape index: {0}]   ;;  %s644_s3 = inlined_call_operand.vmem [shape: f32[1,2,128], index: 3, kind: output, shape index: {1}]  }
   0x1   :  { %v531_v0 = vld [vmem:[%s641_s1] sm:$0xff]   ;;  %v532_v1 = vld [vmem:[%s641_s1 + $0x8] sm:$0xff]   ;;  %v533_v2 = vld [vmem:[%s641_s1 + $0x10] sm:$0xff]  }
   0x2   :  { %493 = vmatprep.subr.bf16.mxu0 %v531_v0  ;;  %519 = vmatprep.subr.bf16.mxu1 %v531_v0  ;;  %v536_v3 = vld [vmem:[%s642_s0] sm:$0xff]   ;;  %v534_v4 = vld [vmem:[%s641_s1 + $0x18] sm:$0xff]   ;;  %v537_v8 = vld [vmem:[%s642_s0 + $0x8] sm:$0xff]  }
   0x3   :  { %494 = vmatpush3.bf16.msra.mxu0 %v531_v0  ;;  %524 = vmatpush3.bf16.msra.mxu1 %v531_v0  ;;  %v540_v5 = vld [vmem:[%s642_s0 + $0x20] sm:$0xff]   ;;  %v541_v9 = vld [vmem:[%s642_s0 + $0x28] sm:$0xff]   ;;  %v538_v10 = vld [vmem:[%s642_s0 + $0x10] sm:$0xff]  }
   0x4   :  { %495 = vmatprep.subr.bf16.mxu0 %v532_v1  ;;  %520 = vmatprep.subr.bf16.mxu1 %v532_v1  ;;  %v535_v6 = vld [vmem:[%s641_s1 + $0x20] ss:$0 sps:$4 sm:$0xff]   ;;  %v542_v11 = vld [vmem:[%s642_s0 + $0x30] sm:$0xff]   ;;  %v539_v12 = vld [vmem:[%s642_s0 + $0x18] sm:$0xff]  }
   0x5   :  { %503 = vmatprep.mubr.msk.bf16.mxu0 %vm106_vm0, %v536_v3  ;;  %511 = vmatprep.mubr.msk.bf16.mxu1 %vm106_vm0, %v540_v5  ;;  %v133_v7 = vsel %vm131_vm1, %v535_v6, 0  ;;  %v543_v13 = vld [vmem:[%s642_s0 + $0x38] sm:$0xff]  }
   0x7   :  { %496 = vmatpush3.bf16.msra.mxu0 %v532_v1  ;;  %525 = vmatpush3.bf16.msra.mxu1 %v532_v1 }
   0x8   :  { %497 = vmatprep.subr.bf16.mxu0 %v533_v2  ;;  %521 = vmatprep.subr.bf16.mxu1 %v533_v2 }
   0xb   :  { %498 = vmatpush3.bf16.msra.mxu0 %v533_v2  ;;  %526 = vmatpush3.bf16.msra.mxu1 %v533_v2 }
   0xc   :  { %499 = vmatprep.subr.bf16.mxu0 %v534_v4  ;;  %522 = vmatprep.subr.bf16.mxu1 %v534_v4 }
   0xf   :  { %500 = vmatpush3.bf16.msra.mxu0 %v534_v4  ;;  %527 = vmatpush3.bf16.msra.mxu1 %v534_v4 }
  0x10   :  { %529 = vmatprep.subr.msk.bf16.mxu0 %vm131_vm1, %v535_v6  ;;  %530 = vmatprep.subr.msk.bf16.mxu1 %vm131_vm1, %v535_v6 }
  0x13   :  { %502 = vmatpush3.bf16.msra.mxu0 %v133_v7  ;;  %528 = vmatpush3.bf16.msra.mxu1 %v133_v7 }
  0x16   :  { %504 = vmatmul.mubr.msk.bf16.vlgmr.msra.gmra.mrb[0].mxu0 %vm106_vm0, %v537_v8  ;;  %512 = vmatmul.mubr.msk.bf16.vlgmr.msra.gmra.mrb[0].mxu1 %vm106_vm0, %v541_v9 }
  0x17   :  { %507 = vmatprep.mubr.msk.bf16.mxu0 %vm106_vm0, %v538_v10  ;;  %515 = vmatprep.mubr.msk.bf16.mxu1 %vm106_vm0, %v542_v11 }
  0x1e   :  { %508 = vmatmul.mubr.msk.bf16.gmra.mrb[4].mxu0 %vm106_vm0, %v539_v12  ;;  %516 = vmatmul.mubr.msk.bf16.gmra.mrb[4].mxu1 %vm106_vm0, %v543_v13 }
  0xe9   :  { %v505_v14 = vpop.f32.mrb[0].mxu0  ;;  %v513_v15 = vpop.f32.mrb[0].mxu1 }
  0xea   :  { %v169_v16 = vpop.f32.mrb[1].mxu0  ;;  %v201_v17 = vpop.f32.mrb[1].mxu1  ;;  %v336_v29 = vmul.f32 %v505_v14, %v505_v14  ;;  %v344_v1 = vmul.f32 %v513_v15, %v513_v15 }
  0xeb   :  { %v506_v18 = vpop.f32.mrb[2].mxu0  ;;  %v514_v19 = vpop.f32.mrb[2].mxu1  ;;  %v334_v20 = vmul.f32 %v169_v16, %v169_v16  ;;  %v342_v59 = vmul.f32 %v201_v17, %v201_v17 }
  0xec   :  { %v441_v21 = vpack.c.bf16 %v506_v18, %v505_v14  ;;  %v172_v22 = vpop.f32.mrb[3].mxu0  ;;  %v461_v23 = vpack.c.bf16 %v514_v19, %v513_v15  ;;  %v204_v24 = vpop.f32.mrb[3].mxu1  ;;  %v337_v32 = vmul.f32 %v506_v18, %v506_v18  ;;  %v345_v4 = vmul.f32 %v514_v19, %v514_v19 }
  0xed   :  { %v436_v25 = vpack.c.bf16 %v172_v22, %v169_v16  ;;  %v312_v26 = vadd.f32 %v172_v22, %v169_v16  ;;  %v335_v27 = vmul.f32 %v172_v22, %v172_v22  ;;  %v456_v28 = vpack.c.bf16 %v204_v24, %v201_v17 }
  0xee   :  { %473 = vst [vmem:[%s643_s2 + $0x8] sm:$0xff] %v441_v21   ;;  %477 = vst [vmem:[%s643_s2 + $0x28] sm:$0xff] %v461_v23   ;;  %v343_v0 = vmul.f32 %v204_v24, %v204_v24 }
  0xef   :  { %437 = vst [vmem:[%s643_s2] sm:$0xff] %v436_v25   ;;  %v313_v30 = vadd.f32 %v505_v14, %v312_v26  ;;  %v350_v31 = vadd.f32 %v335_v27, %v334_v20  ;;  %476 = vst [vmem:[%s643_s2 + $0x20] sm:$0xff] %v456_v28  }
  0xf1   :  { %v351_v33 = vadd.f32 %v350_v31, %v336_v29  ;;  %v509_v34 = vpop.f32.mrb[4].mxu0  ;;  %v314_v35 = vadd.f32 %v506_v18, %v313_v30  ;;  %v517_v36 = vpop.f32.mrb[4].mxu1 }
  0xf2   :  { %v185_v37 = vpop.f32.mrb[5].mxu0  ;;  %v217_v38 = vpop.f32.mrb[5].mxu1  ;;  %v340_v53 = vmul.f32 %v509_v34, %v509_v34  ;;  %v348_v13 = vmul.f32 %v517_v36, %v517_v36 }
  0xf3   :  { %v315_v39 = vadd.f32 %v314_v35, %v185_v37  ;;  %v338_v40 = vmul.f32 %v185_v37, %v185_v37  ;;  %v352_v41 = vadd.f32 %v351_v33, %v337_v32  ;;  %v510_v42 = vpop.f32.mrb[6].mxu0  ;;  %v518_v43 = vpop.f32.mrb[6].mxu1  ;;  %v346_v7 = vmul.f32 %v217_v38, %v217_v38 }
  0xf4   :  { %v451_v44 = vpack.c.bf16 %v510_v42, %v509_v34  ;;  %v188_v45 = vpop.f32.mrb[7].mxu0  ;;  %v471_v46 = vpack.c.bf16 %v518_v43, %v517_v36  ;;  %v220_v47 = vpop.f32.mrb[7].mxu1  ;;  %v341_v56 = vmul.f32 %v510_v42, %v510_v42 }
  0xf5   :  { %v353_v48 = vadd.f32 %v352_v41, %v338_v40  ;;  %v446_v49 = vpack.c.bf16 %v188_v45, %v185_v37  ;;  %v316_v50 = vadd.f32 %v315_v39, %v188_v45  ;;  %v339_v51 = vmul.f32 %v188_v45, %v188_v45 }
  0xf6   :  { %475 = vst [vmem:[%s643_s2 + $0x18] sm:$0xff] %v451_v44   ;;  %479 = vst [vmem:[%s643_s2 + $0x38] sm:$0xff] %v471_v46   ;;  %v466_v52 = vpack.c.bf16 %v220_v47, %v217_v38  ;;  %v347_v12 = vmul.f32 %v220_v47, %v220_v47 }
  0xf7   :  { %474 = vst [vmem:[%s643_s2 + $0x10] sm:$0xff] %v446_v49   ;;  %v317_v54 = vadd.f32 %v509_v34, %v316_v50  ;;  %v354_v55 = vadd.f32 %v353_v48, %v339_v51 }
  0xf8   :  { %478 = vst [vmem:[%s643_s2 + $0x30] sm:$0xff] %v466_v52  }
  0xf9   :  { %v355_v57 = vadd.f32 %v354_v55, %v340_v53  ;;  %v318_v58 = vadd.f32 %v510_v42, %v317_v54 }
  0xfb   :  { %v319_v60 = vadd.f32 %v318_v58, %v201_v17  ;;  %v356_v61 = vadd.f32 %v355_v57, %v341_v56  ;;  %v349_v17 = vmul.f32 %v518_v43, %v518_v43 }
  0xfd   :  { %v357_v62 = vadd.f32 %v356_v61, %v342_v59  ;;  %v320_v63 = vadd.f32 %v319_v60, %v204_v24 }
  0xff   :  { %v321_v2 = vadd.f32 %v513_v15, %v320_v63  ;;  %v358_v3 = vadd.f32 %v357_v62, %v343_v0 }
 0x101   :  { %v359_v5 = vadd.f32 %v358_v3, %v344_v1  ;;  %v322_v6 = vadd.f32 %v514_v19, %v321_v2 }
 0x103   :  { %v323_v8 = vadd.f32 %v322_v6, %v217_v38  ;;  %v360_v9 = vadd.f32 %v359_v5, %v345_v4 }
 0x105   :  { %v361_v10 = vadd.f32 %v360_v9, %v346_v7  ;;  %v324_v11 = vadd.f32 %v323_v8, %v220_v47 }
 0x107   :  { %v325_v14 = vadd.f32 %v517_v36, %v324_v11  ;;  %v362_v16 = vadd.f32 %v361_v10, %v347_v12 }
 0x109   :  { %v326_v18 = vadd.f32 %v518_v43, %v325_v14  ;;  %v363_v20 = vadd.f32 %v362_v16, %v348_v13 }
 0x10b   :  { %v327_v21 = vrot.slane %v326_v18, 4  ;;  %v364_v22 = vadd.f32 %v363_v20, %v349_v17 }
 0x10d   :  { %v328_v23 = vadd.f32 %v327_v21, %v326_v18  ;;  %v365_v15 = vrot.slane %v364_v22, 4 }
 0x10f   :  { %v329_v24 = vrot.slane %v328_v23, 2  ;;  %v366_v25 = vadd.f32 %v365_v15, %v364_v22 }
 0x111   :  { %v330_v26 = vadd.f32 %v329_v24, %v328_v23  ;;  %v367_v19 = vrot.slane %v366_v25, 2 }
 0x113   :  { %v331_v27 = vrot.slane %v330_v26, 1  ;;  %v368_v28 = vadd.f32 %v367_v19, %v366_v25 }
 0x115   :  { %v332_v29 = vadd.f32 %v331_v27, %v330_v26  ;;  %v369_v30 = vrot.slane %v368_v28, 1 }
 0x117   :  { %333 = vst [vmem:[%s644_s3] sm:$0x1] %v332_v29  ;;  %v370_v31 = vadd.f32 %v369_v30, %v368_v28 }
 0x119   :  { %371 = vst [vmem:[%s644_s3 + $0x1] sm:$0x1] %v370_v31 }

// kernel: residual_block_forward.8
= control target key start
LH: loop header
LB: loop body
LE: loop exit
PB: predicated region body
PF: predicated region fallthrough
CT: control target
= control target key end

     0   :  { %vm96_vm0 = vcmask 1041408   ;;  %vm71_vm1 = vcmask 31744   ;;  %s564_s1 = inlined_call_operand.vmem [shape: bf16[4,128], index: 1, kind: input, shape index: {}]   ;;  %s565_s0 = inlined_call_operand.vmem [shape: bf16[128,4], index: 0, kind: input, shape index: {}]   ;;  %s566_s2 = inlined_call_operand.vmem [shape: bf16[128,128], index: 2, kind: output, shape index: {0}]   ;;  %s567_s3 = inlined_call_operand.vmem [shape: f32[1,2,128], index: 3, kind: output, shape index: {1}]  }
   0x1   :  { %v30_v0 = vld [vmem:[%s564_s1] sm:$0x3]  ;;  %v472_v3 = vld [vmem:[%s565_s0 + $0x8] sm:$0xff]   ;;  %v473_v4 = vld [vmem:[%s565_s0 + $0x10] sm:$0xff]  }
   0x2   :  { %469 = vmatprep.subr.msk.bf16.mxu0 %vm96_vm0, %v30_v0  ;;  %v98_v1 = vsel %vm96_vm0, %v30_v0, 0  ;;  %v471_v2 = vld [vmem:[%s565_s0] sm:$0xff]   ;;  %470 = vmatprep.subr.msk.bf16.mxu1 %vm96_vm0, %v30_v0  ;;  %v476_v6 = vld [vmem:[%s565_s0 + $0x28] sm:$0xff]   ;;  %v477_v7 = vld [vmem:[%s565_s0 + $0x30] sm:$0xff]  }
   0x3   :  { %450 = vmatpush3.bf16.msra.mxu0 %v98_v1  ;;  %468 = vmatpush3.bf16.msra.mxu1 %v98_v1  ;;  %v475_v5 = vld [vmem:[%s565_s0 + $0x20] sm:$0xff]   ;;  %v474_v8 = vld [vmem:[%s565_s0 + $0x18] sm:$0xff]  }
   0x4   :  { %451 = vmatprep.mubr.msk.bf16.mxu0 %vm71_vm1, %v471_v2  ;;  %459 = vmatprep.mubr.msk.bf16.mxu1 %vm71_vm1, %v475_v5  ;;  %v478_v9 = vld [vmem:[%s565_s0 + $0x38] sm:$0xff]  }
   0x6   :  { %452 = vmatmul.mubr.msk.bf16.vlgmr.msra.gmra.mrb[0].mxu0 %vm71_vm1, %v472_v3  ;;  %460 = vmatmul.mubr.msk.bf16.vlgmr.msra.gmra.mrb[0].mxu1 %vm71_vm1, %v476_v6 }
   0x7   :  { %455 = vmatprep.mubr.msk.bf16.mxu0 %vm71_vm1, %v473_v4  ;;  %463 = vmatprep.mubr.msk.bf16.mxu1 %vm71_vm1, %v477_v7 }
   0xe   :  { %456 = vmatmul.mubr.msk.bf16.gmra.mrb[4].mxu0 %vm71_vm1, %v474_v8  ;;  %464 = vmatmul.mubr.msk.bf16.gmra.mrb[4].mxu1 %vm71_vm1, %v478_v9 }
  0xd9   :  { %v453_v10 = vpop.f32.mrb[0].mxu0  ;;  %v461_v15 = vpop.f32.mrb[0].mxu1 }
  0xda   :  { %v134_v11 = vpop.f32.mrb[1].mxu0  ;;  %v166_v20 = vpop.f32.mrb[1].mxu1  ;;  %v301_v22 = vmul.f32 %v453_v10, %v453_v10  ;;  %v309_v61 = vmul.f32 %v461_v15, %v461_v15 }
  0xdb   :  { %v454_v12 = vpop.f32.mrb[2].mxu0  ;;  %v299_v16 = vmul.f32 %v134_v11, %v134_v11  ;;  %v462_v21 = vpop.f32.mrb[2].mxu1  ;;  %v307_v55 = vmul.f32 %v166_v20, %v166_v20 }
  0xdc   :  { %v401_v13 = vpack.c.bf16 %v454_v12, %v453_v10  ;;  %v137_v14 = vpop.f32.mrb[3].mxu0  ;;  %v421_v25 = vpack.c.bf16 %v462_v21, %v461_v15  ;;  %v169_v26 = vpop.f32.mrb[3].mxu1  ;;  %v302_v28 = vmul.f32 %v454_v12, %v454_v12  ;;  %v310_v0 = vmul.f32 %v462_v21, %v462_v21 }
  0xdd   :  { %v396_v17 = vpack.c.bf16 %v137_v14, %v134_v11  ;;  %v277_v18 = vadd.f32 %v137_v14, %v134_v11  ;;  %v300_v19 = vmul.f32 %v137_v14, %v137_v14  ;;  %v416_v27 = vpack.c.bf16 %v169_v26, %v166_v20 }
  0xde   :  { %433 = vst [vmem:[%s566_s2 + $0x8] sm:$0xff] %v401_v13   ;;  %437 = vst [vmem:[%s566_s2 + $0x28] sm:$0xff] %v421_v25   ;;  %v308_v60 = vmul.f32 %v169_v26, %v169_v26 }
  0xdf   :  { %397 = vst [vmem:[%s566_s2] sm:$0xff] %v396_v17   ;;  %v278_v23 = vadd.f32 %v453_v10, %v277_v18  ;;  %v315_v24 = vadd.f32 %v300_v19, %v299_v16  ;;  %436 = vst [vmem:[%s566_s2 + $0x20] sm:$0xff] %v416_v27  }
  0xe1   :  { %v316_v29 = vadd.f32 %v315_v24, %v301_v22  ;;  %v457_v30 = vpop.f32.mrb[4].mxu0  ;;  %v279_v31 = vadd.f32 %v454_v12, %v278_v23  ;;  %v465_v39 = vpop.f32.mrb[4].mxu1 }
  0xe2   :  { %v150_v32 = vpop.f32.mrb[5].mxu0  ;;  %v182_v44 = vpop.f32.mrb[5].mxu1  ;;  %v305_v46 = vmul.f32 %v457_v30, %v457_v30  ;;  %v313_v9 = vmul.f32 %v465_v39, %v465_v39 }
  0xe3   :  { %v280_v33 = vadd.f32 %v279_v31, %v150_v32  ;;  %v303_v34 = vmul.f32 %v150_v32, %v150_v32  ;;  %v317_v35 = vadd.f32 %v316_v29, %v302_v28  ;;  %v458_v36 = vpop.f32.mrb[6].mxu0  ;;  %v466_v45 = vpop.f32.mrb[6].mxu1  ;;  %v311_v3 = vmul.f32 %v182_v44, %v182_v44 }
  0xe4   :  { %v411_v37 = vpack.c.bf16 %v458_v36, %v457_v30  ;;  %v153_v38 = vpop.f32.mrb[7].mxu0  ;;  %v431_v49 = vpack.c.bf16 %v466_v45, %v465_v39  ;;  %v185_v50 = vpop.f32.mrb[7].mxu1  ;;  %v306_v52 = vmul.f32 %v458_v36, %v458_v36  ;;  %v314_v12 = vmul.f32 %v466_v45, %v466_v45 }
  0xe5   :  { %v318_v40 = vadd.f32 %v317_v35, %v303_v34  ;;  %v406_v41 = vpack.c.bf16 %v153_v38, %v150_v32  ;;  %v281_v42 = vadd.f32 %v280_v33, %v153_v38  ;;  %v304_v43 = vmul.f32 %v153_v38, %v153_v38 }
  0xe6   :  { %435 = vst [vmem:[%s566_s2 + $0x18] sm:$0xff] %v411_v37   ;;  %v426_v51 = vpack.c.bf16 %v185_v50, %v182_v44  ;;  %439 = vst [vmem:[%s566_s2 + $0x38] sm:$0xff] %v431_v49   ;;  %v312_v8 = vmul.f32 %v185_v50, %v185_v50 }
  0xe7   :  { %434 = vst [vmem:[%s566_s2 + $0x10] sm:$0xff] %v406_v41   ;;  %v282_v47 = vadd.f32 %v457_v30, %v281_v42  ;;  %v319_v48 = vadd.f32 %v318_v40, %v304_v43 }
  0xe8   :  { %438 = vst [vmem:[%s566_s2 + $0x30] sm:$0xff] %v426_v51  }
  0xe9   :  { %v320_v53 = vadd.f32 %v319_v48, %v305_v46  ;;  %v283_v54 = vadd.f32 %v458_v36, %v282_v47 }
  0xeb   :  { %v284_v56 = vadd.f32 %v283_v54, %v166_v20  ;;  %v321_v57 = vadd.f32 %v320_v53, %v306_v52 }
  0xed   :  { %v322_v58 = vadd.f32 %v321_v57, %v307_v55  ;;  %v285_v59 = vadd.f32 %v284_v56, %v169_v26 }
  0xef   :  { %v286_v62 = vadd.f32 %v461_v15, %v285_v59  ;;  %v323_v63 = vadd.f32 %v322_v58, %v308_v60 }
  0xf1   :  { %v324_v1 = vadd.f32 %v323_v63, %v309_v61  ;;  %v287_v2 = vadd.f32 %v462_v21, %v286_v62 }
  0xf3   :  { %v288_v4 = vadd.f32 %v287_v2, %v182_v44  ;;  %v325_v5 = vadd.f32 %v324_v1, %v310_v0 }
  0xf5   :  { %v326_v6 = vadd.f32 %v325_v5, %v311_v3  ;;  %v289_v7 = vadd.f32 %v288_v4, %v185_v50 }
  0xf7   :  { %v290_v10 = vadd.f32 %v465_v39, %v289_v7  ;;  %v327_v11 = vadd.f32 %v326_v6, %v312_v8 }
  0xf9   :  { %v291_v13 = vadd.f32 %v466_v45, %v290_v10  ;;  %v328_v14 = vadd.f32 %v327_v11, %v313_v9 }
  0xfb   :  { %v292_v16 = vrot.slane %v291_v13, 4  ;;  %v329_v17 = vadd.f32 %v328_v14, %v314_v12 }
  0xfd   :  { %v293_v18 = vadd.f32 %v292_v16, %v291_v13  ;;  %v330_v15 = vrot.slane %v329_v17, 4 }
  0xff   :  { %v294_v19 = vrot.slane %v293_v18, 2  ;;  %v331_v20 = vadd.f32 %v330_v15, %v329_v17 }
 0x101   :  { %v295_v22 = vadd.f32 %v294_v19, %v293_v18  ;;  %v332_v21 = vrot.slane %v331_v20, 2 }
 0x103   :  { %v296_v23 = vrot.slane %v295_v22, 1  ;;  %v333_v24 = vadd.f32 %v332_v21, %v331_v20 }
 0x105   :  { %v297_v25 = vadd.f32 %v296_v23, %v295_v22  ;;  %v334_v26 = vrot.slane %v333_v24, 1 }
 0x107   :  { %298 = vst [vmem:[%s567_s3] sm:$0x1] %v297_v25  ;;  %v335_v27 = vadd.f32 %v334_v26, %v333_v24 }
 0x109   :  { %336 = vst [vmem:[%s567_s3 + $0x1] sm:$0x1] %v335_v27 }

// kernel: residual_block_forward.9
= control target key start
LH: loop header
LB: loop body
LE: loop exit
PB: predicated region body
PF: predicated region fallthrough
CT: control target
= control target key end

     0   :  { %v44_v0 = vlaneseq  ;;  %s352_s0 = inlined_call_operand.vmem [shape: bf16[128,128], index: 0, kind: input, shape index: {}]   ;;  %s353_s1 = inlined_call_operand.vmem [shape: f32[2,128], index: 1, kind: input, shape index: {}]   ;;  %s354_s2 = inlined_call_operand.vmem [shape: bf16[128,128], index: 2, kind: output, shape index: {}]  }
   0x1   :  { %v201_v1 = vld [vmem:[%s352_s0] sm:$0xff]   ;;  %v272_v2 = vld [vmem:[%s352_s0 + $0x8] sm:$0xff]   ;;  %v273_v4 = vld [vmem:[%s352_s0 + $0x10] sm:$0xff]  }
   0x2   :  { %v45_v3 = vshrl.u32 %v44_v0, 7  ;;  %v274_v5 = vld [vmem:[%s352_s0 + $0x18] sm:$0xff]   ;;  %v275_v6 = vld [vmem:[%s352_s0 + $0x20] sm:$0xff]   ;;  %v202_v8 = vunpack.c.l.bf16 %v201_v1  ;;  %v203_v9 = vunpack.c.h.bf16 %v201_v1  ;;  %v206_v10 = vunpack.c.l.bf16 %v272_v2  ;;  %v276_v12 = vld [vmem:[%s352_s0 + $0x28] sm:$0xff]  }
   0x3   :  { %v11_v7 = vld [vmem:[%s353_s1] sm:$0x3]  ;;  %v207_v11 = vunpack.c.h.bf16 %v272_v2  ;;  %v210_v15 = vunpack.c.l.bf16 %v273_v4  ;;  %v211_v16 = vunpack.c.h.bf16 %v273_v4  ;;  %v277_v17 = vld [vmem:[%s352_s0 + $0x30] sm:$0xff]   ;;  %v278_v18 = vld [vmem:[%s352_s0 + $0x38] sm:$0xff]   ;;  %v214_v19 = vunpack.c.l.bf16 %v274_v5 }
   0x4   :  { %v46_v13 = vsub.s32 0, %v45_v3  ;;  %v66_v14 = vsub.s32 1, %v45_v3  ;;  %v215_v20 = vunpack.c.h.bf16 %v274_v5  ;;  %v218_v21 = vunpack.c.l.bf16 %v275_v6 }
   0x5   :  { %v219_v22 = vunpack.c.h.bf16 %v275_v6  ;;  %v222_v25 = vunpack.c.l.bf16 %v276_v12  ;;  %v223_v26 = vunpack.c.h.bf16 %v276_v12  ;;  %v226_v27 = vunpack.c.l.bf16 %v277_v17 }
   0x6   :  { %v47_v23 = vrot.slane %v11_v7, %v46_v13  ;;  %v67_v24 = vrot.slane %v11_v7, %v66_v14  ;;  %v227_v28 = vunpack.c.h.bf16 %v277_v17  ;;  %v230_v29 = vunpack.c.l.bf16 %v278_v18 }
   0x7   :  { %v231_v30 = vunpack.c.h.bf16 %v278_v18 }
   0x8   :  { %v48_v31 = vmul.f32 %v202_v8, %v47_v23  ;;  %v49_v32 = vmul.f32 %v203_v9, %v47_v23  ;;  %v50_v33 = vmul.f32 %v206_v10, %v47_v23  ;;  %v51_v34 = vmul.f32 %v207_v11, %v47_v23 }
   0x9   :  { %v52_v35 = vmul.f32 %v210_v15, %v47_v23  ;;  %v53_v36 = vmul.f32 %v211_v16, %v47_v23  ;;  %v54_v37 = vmul.f32 %v214_v19, %v47_v23  ;;  %v55_v38 = vmul.f32 %v215_v20, %v47_v23 }
   0xa   :  { %v68_v39 = vadd.f32 %v67_v24, %v48_v31  ;;  %v69_v40 = vadd.f32 %v67_v24, %v49_v32  ;;  %v70_v41 = vadd.f32 %v67_v24, %v50_v33  ;;  %v71_v42 = vadd.f32 %v67_v24, %v51_v34 }
   0xb   :  { %v72_v43 = vadd.f32 %v67_v24, %v52_v35  ;;  %v73_v44 = vadd.f32 %v67_v24, %v53_v36  ;;  %v74_v45 = vadd.f32 %v67_v24, %v54_v37  ;;  %v75_v46 = vadd.f32 %v67_v24, %v55_v38 }
   0xc   :  { %v235_v47 = vpack.c.bf16 %v69_v40, %v68_v39  ;;  %v240_v48 = vpack.c.bf16 %v71_v42, %v70_v41  ;;  %v56_v49 = vmul.f32 %v218_v21, %v47_v23  ;;  %v57_v50 = vmul.f32 %v219_v22, %v47_v23 }
   0xd   :  { %v245_v51 = vpack.c.bf16 %v73_v44, %v72_v43  ;;  %v250_v52 = vpack.c.bf16 %v75_v46, %v74_v45  ;;  %v58_v53 = vmul.f32 %v222_v25, %v47_v23  ;;  %v59_v54 = vmul.f32 %v223_v26, %v47_v23 }
   0xe   :  { %236 = vst [vmem:[%s354_s2] sm:$0xff] %v235_v47   ;;  %279 = vst [vmem:[%s354_s2 + $0x8] sm:$0xff] %v240_v48   ;;  %v76_v55 = vadd.f32 %v67_v24, %v56_v49  ;;  %v77_v56 = vadd.f32 %v67_v24, %v57_v50  ;;  %v60_v57 = vmul.f32 %v226_v27, %v47_v23 }
   0xf   :  { %v61_v58 = vmul.f32 %v227_v28, %v47_v23  ;;  %280 = vst [vmem:[%s354_s2 + $0x10] sm:$0xff] %v245_v51   ;;  %281 = vst [vmem:[%s354_s2 + $0x18] sm:$0xff] %v250_v52   ;;  %v78_v59 = vadd.f32 %v67_v24, %v58_v53  ;;  %v79_v60 = vadd.f32 %v67_v24, %v59_v54 }
  0x10   :  { %v62_v61 = vmul.f32 %v230_v29, %v47_v23  ;;  %v63_v62 = vmul.f32 %v231_v30, %v47_v23  ;;  %v255_v63 = vpack.c.bf16 %v77_v56, %v76_v55  ;;  %v80_v0 = vadd.f32 %v67_v24, %v60_v57 }
  0x11   :  { %v81_v1 = vadd.f32 %v67_v24, %v61_v58  ;;  %v260_v2 = vpack.c.bf16 %v79_v60, %v78_v59 }
  0x12   :  { %v82_v3 = vadd.f32 %v67_v24, %v62_v61  ;;  %v83_v4 = vadd.f32 %v67_v24, %v63_v62  ;;  %282 = vst [vmem:[%s354_s2 + $0x20] sm:$0xff] %v255_v63  }
  0x13   :  { %v265_v5 = vpack.c.bf16 %v81_v1, %v80_v0  ;;  %283 = vst [vmem:[%s354_s2 + $0x28] sm:$0xff] %v260_v2  }
  0x14   :  { %v270_v6 = vpack.c.bf16 %v83_v4, %v82_v3 }
  0x15   :  { %284 = vst [vmem:[%s354_s2 + $0x30] sm:$0xff] %v265_v5  }
  0x16   :  { %285 = vst [vmem:[%s354_s2 + $0x38] sm:$0xff] %v270_v6  }

// kernel: residual_block_forward.11
= control target key start
LH: loop header
LB: loop body
LE: loop exit
PB: predicated region body
PF: predicated region fallthrough
CT: control target
= control target key end

     0   :  { %v47_v0 = vlaneseq  ;;  %s410_s0 = inlined_call_operand.vmem [shape: bf16[128,128], index: 0, kind: input, shape index: {}]   ;;  %s411_s1 = inlined_call_operand.vmem [shape: f32[2,128], index: 1, kind: input, shape index: {}]   ;;  %s412_s2 = inlined_call_operand.vmem [shape: bf16[128,128], index: 2, kind: input, shape index: {}]   ;;  %s413_s3 = inlined_call_operand.vmem [shape: f32[128,128], index: 3, kind: output, shape index: {}]  }
   0x1   :  { %v14_v1 = vld [vmem:[%s411_s1] sm:$0x3]  ;;  %v235_v8 = vld [vmem:[%s410_s0 + $0x8] sm:$0xff]   ;;  %v236_v10 = vld [vmem:[%s410_s0 + $0x10] sm:$0xff]  }
   0x2   :  { %v172_v2 = vld [vmem:[%s410_s0] sm:$0xff]   ;;  %v48_v5 = vshrl.u32 %v47_v0, 7  ;;  %v242_v9 = vld [vmem:[%s412_s2 + $0x8] sm:$0xff]   ;;  %v177_v12 = vunpack.c.l.bf16 %v235_v8  ;;  %v178_v14 = vunpack.c.h.bf16 %v235_v8  ;;  %v243_v15 = vld [vmem:[%s412_s2 + $0x10] sm:$0xff]   ;;  %v181_v21 = vunpack.c.l.bf16 %v236_v10 }
   0x3   :  { %v204_v3 = vld [vmem:[%s412_s2] sm:$0xff]   ;;  %v173_v4 = vunpack.c.l.bf16 %v172_v2  ;;  %v174_v7 = vunpack.c.h.bf16 %v172_v2  ;;  %v209_v13 = vunpack.c.l.bf16 %v242_v9  ;;  %v237_v16 = vld [vmem:[%s410_s0 + $0x18] sm:$0xff]   ;;  %v210_v20 = vunpack.c.h.bf16 %v242_v9  ;;  %v239_v60 = vld [vmem:[%s410_s0 + $0x28] sm:$0xff]  }
   0x4   :  { %v205_v6 = vunpack.c.l.bf16 %v204_v3  ;;  %v206_v11 = vunpack.c.h.bf16 %v204_v3  ;;  %v244_v17 = vld [vmem:[%s412_s2 + $0x18] sm:$0xff]   ;;  %v49_v18 = vsub.s32 0, %v48_v5  ;;  %v69_v19 = vsub.s32 1, %v48_v5  ;;  %v238_v22 = vld [vmem:[%s410_s0 + $0x20] sm:$0xff]   ;;  %v240_v2 = vld [vmem:[%s410_s0 + $0x30] sm:$0xff]  }
   0x5   :  { %v302_v23 = vld [vmem:[%s412_s2 + $0x20] sm:$0xff]   ;;  %v213_v24 = vunpack.c.l.bf16 %v243_v15  ;;  %v182_v25 = vunpack.c.h.bf16 %v236_v10  ;;  %v214_v26 = vunpack.c.h.bf16 %v243_v15  ;;  %v185_v27 = vunpack.c.l.bf16 %v237_v16 }
   0x6   :  { %v304_v28 = vrot.slane %v14_v1, %v49_v18  ;;  %v306_v29 = vrot.slane %v14_v1, %v69_v19  ;;  %v217_v30 = vunpack.c.l.bf16 %v244_v17  ;;  %v186_v31 = vunpack.c.h.bf16 %v237_v16  ;;  %v246_v1 = vld [vmem:[%s412_s2 + $0x28] sm:$0xff]   ;;  %v241_v16 = vld [vmem:[%s410_s0 + $0x38] sm:$0xff]  }
   0x7   :  { %v218_v32 = vunpack.c.h.bf16 %v244_v17  ;;  %v189_v33 = vunpack.c.l.bf16 %v238_v22  ;;  %v221_v34 = vunpack.c.l.bf16 %v302_v23  ;;  %v190_v35 = vunpack.c.h.bf16 %v238_v22 }
   0x8   :  { %v51_v36 = vmul.f32 %v173_v4, %v304_v28  ;;  %v52_v37 = vmul.f32 %v174_v7, %v304_v28  ;;  %v53_v38 = vmul.f32 %v177_v12, %v304_v28  ;;  %v54_v39 = vmul.f32 %v178_v14, %v304_v28  ;;  %v247_v7 = vld [vmem:[%s412_s2 + $0x30] sm:$0xff]  }
   0x9   :  { %v55_v40 = vmul.f32 %v181_v21, %v304_v28  ;;  %v56_v41 = vmul.f32 %v182_v25, %v304_v28  ;;  %v57_v42 = vmul.f32 %v185_v27, %v304_v28  ;;  %v58_v43 = vmul.f32 %v186_v31, %v304_v28  ;;  %v248_v21 = vld [vmem:[%s412_s2 + $0x38] sm:$0xff]  }
   0xa   :  { %v71_v44 = vadd.f32 %v306_v29, %v51_v36  ;;  %v72_v45 = vadd.f32 %v306_v29, %v52_v37  ;;  %v73_v46 = vadd.f32 %v306_v29, %v53_v38  ;;  %v74_v47 = vadd.f32 %v306_v29, %v54_v39 }
   0xb   :  { %v75_v48 = vadd.f32 %v306_v29, %v55_v40  ;;  %v76_v49 = vadd.f32 %v306_v29, %v56_v41  ;;  %v77_v50 = vadd.f32 %v306_v29, %v57_v42  ;;  %v78_v51 = vadd.f32 %v306_v29, %v58_v43 }
   0xc   :  { %v119_v52 = vadd.f32 %v205_v6, %v71_v44  ;;  %v120_v53 = vadd.f32 %v206_v11, %v72_v45  ;;  %v121_v54 = vadd.f32 %v209_v13, %v73_v46  ;;  %v122_v55 = vadd.f32 %v210_v20, %v74_v47 }
   0xd   :  { %v123_v56 = vadd.f32 %v213_v24, %v75_v48  ;;  %v124_v57 = vadd.f32 %v214_v26, %v76_v49  ;;  %v125_v58 = vadd.f32 %v217_v30, %v77_v50  ;;  %v126_v59 = vadd.f32 %v218_v32, %v78_v51 }
   0xe   :  { %v135_v61 = vmax.f32 %v119_v52, 0.0  ;;  %v136_v62 = vmax.f32 %v120_v53, 0.0  ;;  %v137_v63 = vmax.f32 %v121_v54, 0.0  ;;  %v138_v0 = vmax.f32 %v122_v55, 0.0 }
   0xf   :  { %v139_v3 = vmax.f32 %v123_v56, 0.0  ;;  %v140_v4 = vmax.f32 %v124_v57, 0.0  ;;  %v141_v5 = vmax.f32 %v125_v58, 0.0  ;;  %v142_v6 = vmax.f32 %v126_v59, 0.0 }
  0x10   :  { %151 = vst [vmem:[%s413_s3] sm:$0xff] %v135_v61  ;;  %152 = vst [vmem:[%s413_s3 + $0x8] sm:$0xff] %v136_v62  ;;  %v59_v8 = vmul.f32 %v189_v33, %v304_v28  ;;  %v60_v9 = vmul.f32 %v190_v35, %v304_v28  ;;  %v222_v10 = vunpack.c.h.bf16 %v302_v23  ;;  %v193_v11 = vunpack.c.l.bf16 %v239_v60 }
  0x11   :  { %153 = vst [vmem:[%s413_s3 + $0x10] sm:$0xff] %v137_v63  ;;  %154 = vst [vmem:[%s413_s3 + $0x18] sm:$0xff] %v138_v0  ;;  %v225_v12 = vunpack.c.l.bf16 %v246_v1  ;;  %v194_v13 = vunpack.c.h.bf16 %v239_v60  ;;  %v226_v14 = vunpack.c.h.bf16 %v246_v1  ;;  %v197_v15 = vunpack.c.l.bf16 %v240_v2 }
  0x12   :  { %155 = vst [vmem:[%s413_s3 + $0x20] sm:$0xff] %v139_v3  ;;  %156 = vst [vmem:[%s413_s3 + $0x28] sm:$0xff] %v140_v4  ;;  %v79_v17 = vadd.f32 %v306_v29, %v59_v8  ;;  %v80_v18 = vadd.f32 %v306_v29, %v60_v9  ;;  %v61_v19 = vmul.f32 %v193_v11, %v304_v28  ;;  %v229_v20 = vunpack.c.l.bf16 %v247_v7 }
  0x13   :  { %157 = vst [vmem:[%s413_s3 + $0x30] sm:$0xff] %v141_v5  ;;  %158 = vst [vmem:[%s413_s3 + $0x38] sm:$0xff] %v142_v6  ;;  %v62_v22 = vmul.f32 %v194_v13, %v304_v28  ;;  %v63_v24 = vmul.f32 %v197_v15, %v304_v28  ;;  %v198_v25 = vunpack.c.h.bf16 %v240_v2  ;;  %v230_v26 = vunpack.c.h.bf16 %v247_v7 }
  0x14   :  { %v127_v27 = vadd.f32 %v221_v34, %v79_v17  ;;  %v128_v30 = vadd.f32 %v222_v10, %v80_v18  ;;  %v81_v31 = vadd.f32 %v306_v29, %v61_v19  ;;  %v201_v32 = vunpack.c.l.bf16 %v241_v16 }
  0x15   :  { %v82_v33 = vadd.f32 %v306_v29, %v62_v22  ;;  %v83_v35 = vadd.f32 %v306_v29, %v63_v24  ;;  %v64_v36 = vmul.f32 %v198_v25, %v304_v28  ;;  %v233_v37 = vunpack.c.l.bf16 %v248_v21 }
  0x16   :  { %v143_v38 = vmax.f32 %v127_v27, 0.0  ;;  %v144_v39 = vmax.f32 %v128_v30, 0.0  ;;  %v129_v40 = vadd.f32 %v225_v12, %v81_v31  ;;  %v65_v41 = vmul.f32 %v201_v32, %v304_v28 }
  0x17   :  { %v130_v42 = vadd.f32 %v226_v14, %v82_v33  ;;  %v131_v43 = vadd.f32 %v229_v20, %v83_v35  ;;  %v84_v23 = vadd.f32 %v306_v29, %v64_v36  ;;  %v202_v34 = vunpack.c.h.bf16 %v241_v16 }
  0x18   :  { %159 = vst [vmem:[%s413_s3 + $0x40] sm:$0xff] %v143_v38  ;;  %160 = vst [vmem:[%s413_s3 + $0x48] sm:$0xff] %v144_v39  ;;  %v145_v44 = vmax.f32 %v129_v40, 0.0  ;;  %v85_v45 = vadd.f32 %v306_v29, %v65_v41  ;;  %v234_v46 = vunpack.c.h.bf16 %v248_v21 }
  0x19   :  { %v146_v47 = vmax.f32 %v130_v42, 0.0  ;;  %v147_v48 = vmax.f32 %v131_v43, 0.0  ;;  %v132_v49 = vadd.f32 %v230_v26, %v84_v23  ;;  %v66_v50 = vmul.f32 %v202_v34, %v304_v28 }
  0x1a   :  { %161 = vst [vmem:[%s413_s3 + $0x50] sm:$0xff] %v145_v44  ;;  %v133_v51 = vadd.f32 %v233_v37, %v85_v45 }
  0x1b   :  { %162 = vst [vmem:[%s413_s3 + $0x58] sm:$0xff] %v146_v47  ;;  %163 = vst [vmem:[%s413_s3 + $0x60] sm:$0xff] %v147_v48  ;;  %v148_v52 = vmax.f32 %v132_v49, 0.0  ;;  %v86_v53 = vadd.f32 %v306_v29, %v66_v50 }
  0x1c   :  { %v149_v54 = vmax.f32 %v133_v51, 0.0 }
  0x1d   :  { %164 = vst [vmem:[%s413_s3 + $0x68] sm:$0xff] %v148_v52  ;;  %v134_v28 = vadd.f32 %v234_v46, %v86_v53 }
  0x1e   :  { %165 = vst [vmem:[%s413_s3 + $0x70] sm:$0xff] %v149_v54 }
  0x1f   :  { %v150_v55 = vmax.f32 %v134_v28, 0.0 }
  0x21   :  { %166 = vst [vmem:[%s413_s3 + $0x78] sm:$0xff] %v150_v55 }

</bundles_post_ra>
